<compile_context>
chip_gen: v6e
topology: v6e:2x2x1
jax: 0.10.0
libtpu: 0.0.40
codegen_flags: <defaults>
</compile_context>

<pallas_src>
import functools
import math

import jax
import jax.numpy as jnp
from jax.experimental import pallas as pl
from jax.experimental.pallas import tpu as pltpu


def _swin_attn_kernel(x_ref, wqkv_ref, bqkv_ref, wo_ref, bo_ref,
                      gamma_ref, beta_ref, mask_ref, o_ref,
                      *, num_heads, ln_eps, tau, v_threshold):
    x = x_ref[...]                                   # (C, M) bf16, tokens on lanes
    C, M = x.shape
    dh = C // num_heads

    x_f32 = x.astype(jnp.float32)                    # residual path in f32

    # ---- fused QKV projection: one bf16 MXU matmul, f32 accumulate --------
    # Weights are (3C, C) with 1/sqrt(dh) already folded into the Q rows.
    qkv = jnp.dot(wqkv_ref[...], x, preferred_element_type=jnp.float32)
    qkv = qkv + bqkv_ref[...]                        # (3C, M) f32

    mask_add = mask_ref[...]                         # (M, M) f32, resident (DMA'd once)
    wo = wo_ref[...]                                 # (C, C) bf16, (out, in)

    # ---- block-diagonal (per-window) attention, Wo folded per head --------
    proj = jnp.zeros((C, M), jnp.float32)
    for h in range(num_heads):                       # static, small (<=4)
        qh = qkv[h * dh:(h + 1) * dh, :].astype(jnp.bfloat16)            # (dh, M)
        kh = qkv[C + h * dh:C + (h + 1) * dh, :].astype(jnp.bfloat16)
        vh = qkv[2 * C + h * dh:2 * C + (h + 1) * dh, :].astype(jnp.bfloat16)
        # scores (M_q, M_k): contraction over dh (sublane axis), lane-dense
        s = jax.lax.dot_general(qh, kh, (((0,), (0,)), ((), ())),
                                preferred_element_type=jnp.float32)
        s = s + mask_add
        m = jnp.max(s, axis=-1, keepdims=True)
        p = jnp.exp(s - m)
        denom = jnp.sum(p, axis=-1, keepdims=True)
        p = p * pl.reciprocal(denom, approx=True)    # EUP divide (free slot)
        # out_h[d, q] = sum_k vh[d, k] * p[q, k]  -> (dh, M)
        out_h = jax.lax.dot_general(vh, p.astype(jnp.bfloat16),
                                    (((1,), (1,)), ((), ())),
                                    preferred_element_type=jnp.float32)
        # fold the output projection into the loop: (C, dh) @ (dh, M)
        proj = proj + jnp.dot(wo[:, h * dh:(h + 1) * dh],
                              out_h.astype(jnp.bfloat16),
                              preferred_element_type=jnp.float32)

    # ---- bias + residual + LayerNorm (over channels = sublanes) + LIF -----
    h_res = proj + bo_ref[...] + x_f32
    mean = jnp.mean(h_res, axis=0, keepdims=True)
    var = jnp.mean(jnp.square(h_res - mean), axis=0, keepdims=True)
    y = (h_res - mean) * jax.lax.rsqrt(var + ln_eps)
    y = y * gamma_ref[...] + beta_ref[...]

    # Single-step LIF (spikingjelly defaults: tau=2, v_th=1, v_reset=0,
    # decay_input=True) from the rest state v=0:
    #   v = y / tau ; spike = heaviside(v - v_threshold)
    # TODO(synk): stateful multi-step membrane dynamics and the sigmoid
    #             surrogate (backward only) are not modeled here.
    spike = (y * (1.0 / tau) >= v_threshold)
    o_ref[...] = spike.astype(o_ref.dtype)           # lane-dense (C, M) store


def _pick_block_tokens(total_tokens, tokens_per_window):
    """Tokens per grid step: a multiple of both the window size and 128
    (lane-dense) that divides the total, keeping >=2 grid steps; otherwise
    fall back to the whole slab (lanes == full array dim is always legal)."""
    lcm = tokens_per_window * 128 // math.gcd(tokens_per_window, 128)
    if total_tokens % lcm == 0 and total_tokens // lcm >= 2:
        return lcm
    return total_tokens


@functools.partial(jax.jit, static_argnames=("window_size", "shift_size",
                                             "num_heads"))
def spiking_shifted_window_attention_3d(x, params, *, window_size, shift_size,
                                        num_heads):
    """x: (B, C, D, H, W) float32 NCDHW (matching the PyTorch module).

    Returns spikes in bfloat16 ({0,1} is exact) to halve HBM writeback."""
    B, C, D, H, W = x.shape
    wd, wh, ww = window_size
    sd, sh, sw = shift_size
    assert D % wd == 0 and H % wh == 0 and W % ww == 0
    do_shift = any(s > 0 for s in shift_size)
    if do_shift:
        # TODO(synk): cyclic shift kept as an XLA roll; wrap-around windows
        #             cannot be expressed as a rectangular BlockSpec gather.
        x = jnp.roll(x, (-sd, -sh, -sw), axis=(2, 3, 4))

    nd, nh_, nw_ = D // wd, H // wh, W // ww
    N = wd * wh * ww
    NW = B * nd * nh_ * nw_
    T_tot = NW * N

    # Lane-major window partition: (B,C,D,H,W) -> (C, NW*N), tokens on lanes,
    # window-major token ordering (windows never straddle block boundaries).
    xw = x.reshape(B, C, nd, wd, nh_, wh, nw_, ww)
    xw = xw.transpose(1, 0, 2, 4, 6, 3, 5, 7).reshape(C, T_tot)
    xw = xw.astype(jnp.bfloat16)          # halve token-stream DMA bytes

    M = _pick_block_tokens(T_tot, N)      # 128 for the test shapes
    grid = (T_tot // M,)

    dh = C // num_heads
    scale = 1.0 / math.sqrt(dh)
    # Weights in (out_features, in_features) orientation for the transposed
    # slab; Q/K/V fused into one (3C, C) weight with 1/sqrt(dh) folded into Q.
    wqkv = jnp.concatenate([params['wq_t'].T * scale, params['wk_t'].T,
                            params['wv_t'].T], axis=0).astype(jnp.bfloat16)
    bqkv = jnp.concatenate([params['bq'] * scale, params['bk'],
                            params['bv']], axis=1).reshape(3 * C, 1)
    wo = params['wo_t'].T.astype(jnp.bfloat16)                    # (C, C)
    bo = params['bo'].reshape(C, 1)
    gamma = params['ln_gamma'].reshape(C, 1)
    beta = params['ln_beta'].reshape(C, 1)

    # Additive block-diagonal window mask, built ONCE here and kept resident
    # in VMEM via a constant index_map (token i attends j iff i//N == j//N).
    tok_win = (jnp.arange(M, dtype=jnp.int32) // N)
    mask = jnp.where(tok_win[:, None] == tok_win[None, :],
                     0.0, -1e30).astype(jnp.float32)

    kernel = functools.partial(_swin_attn_kernel, num_heads=num_heads,
                               ln_eps=1e-5, tau=2.0, v_threshold=1.0)

    def const(shape):
        return pl.BlockSpec(shape, lambda i: (0,) * len(shape))

    out = pl.pallas_call(
        kernel,
        out_shape=jax.ShapeDtypeStruct((C, T_tot), jnp.bfloat16),
        grid=grid,
        in_specs=[
            pl.BlockSpec((C, M), lambda i: (0, i)),            # token slab block
            const((3 * C, C)), const((3 * C, 1)),              # fused Wqkv, b
            const((C, C)), const((C, 1)),                      # Wo, bo
            const((C, 1)), const((C, 1)),                      # LN gamma, beta
            const((M, M)),                                     # window mask
        ],
        out_specs=pl.BlockSpec((C, M), lambda i: (0, i)),
        compiler_params=pltpu.CompilerParams(
            dimension_semantics=("parallel",),
            vmem_limit_bytes=32 * 1024 * 1024),
    )(xw, wqkv, bqkv, wo, bo, gamma, beta, mask)

    # inverse window partition: (C, NW*N) -> (B, C, D, H, W)
    y = out.reshape(C, B, nd, nh_, nw_, wd, wh, ww)
    y = y.transpose(1, 0, 2, 5, 3, 6, 4, 7).reshape(B, C, D, H, W)
    if do_shift:
        y = jnp.roll(y, (sd, sh, sw), axis=(2, 3, 4))
    return y


def init_params(key, embed_dim):
    """Deterministic synthetic parameters (shapes match nn.MultiheadAttention
    + nn.LayerNorm in the PyTorch module)."""
    C = embed_dim
    ks = jax.random.split(key, 4)
    s = 1.0 / math.sqrt(C)
    in_proj_w = jax.random.uniform(ks[0], (3 * C, C), jnp.float32, -s, s)
    in_proj_b = 0.02 * jax.random.normal(ks[1], (3 * C,), jnp.float32)
    out_w = jax.random.uniform(ks[2], (C, C), jnp.float32, -s, s)
    out_b = 0.02 * jax.random.normal(ks[3], (C,), jnp.float32)
    wq, wk, wv = in_proj_w[:C], in_proj_w[C:2 * C], in_proj_w[2 * C:]
    return {
        'wq_t': wq.T, 'wk_t': wk.T, 'wv_t': wv.T,
        'bq': in_proj_b[:C].reshape(1, C),
        'bk': in_proj_b[C:2 * C].reshape(1, C),
        'bv': in_proj_b[2 * C:].reshape(1, C),
        'wo_t': out_w.T, 'bo': out_b.reshape(1, C),
        'ln_gamma': jnp.ones((1, C), jnp.float32),
        'ln_beta': jnp.zeros((1, C), jnp.float32),
    }


def reference_forward(x, params, *, window_size, shift_size, num_heads):
    """Pure-JAX f32 reference mirroring the PyTorch forward (eval mode)."""
    B, C, D, H, W = x.shape
    wd, wh, ww = window_size
    sd, sh, sw = shift_size
    do_shift = any(s > 0 for s in shift_size)
    if do_shift:
        x = jnp.roll(x, (-sd, -sh, -sw), axis=(2, 3, 4))
    nd, nh_, nw_ = D // wd, H // wh, W // ww
    N = wd * wh * ww
    xw = x.reshape(B, C, nd, wd, nh_, wh, nw_, ww)
    xw = xw.transpose(0, 2, 4, 6, 1, 3, 5, 7).reshape(-1, C, N).transpose(0, 2, 1)
    residual = xw
    NW = xw.shape[0]
    dh = C // num_heads
    q = xw @ params['wq_t'] + params['bq']
    k = xw @ params['wk_t'] + params['bk']
    v = xw @ params['wv_t'] + params['bv']
    q = q.reshape(NW, N, num_heads, dh).transpose(0, 2, 1, 3)
    k = k.reshape(NW, N, num_heads, dh).transpose(0, 2, 1, 3)
    v = v.reshape(NW, N, num_heads, dh).transpose(0, 2, 1, 3)
    s = jnp.einsum('bhqd,bhkd->bhqk', q, k) / math.sqrt(dh)
    p = jax.nn.softmax(s, axis=-1)
    o = jnp.einsum('bhqk,bhkd->bhqd', p, v)
    o = o.transpose(0, 2, 1, 3).reshape(NW, N, C)
    attn = o @ params['wo_t'] + params['bo']
    h = attn + residual
    mean = h.mean(-1, keepdims=True)
    var = ((h - mean) ** 2).mean(-1, keepdims=True)
    y = (h - mean) / jnp.sqrt(var + 1e-5)
    y = y * params['ln_gamma'] + params['ln_beta']
    spike = (y / 2.0 >= 1.0).astype(jnp.float32)
    y = spike.transpose(0, 2, 1).reshape(B, nd, nh_, nw_, C, wd, wh, ww)
    y = y.transpose(0, 4, 1, 5, 2, 6, 3, 7).reshape(B, C, D, H, W)
    if do_shift:
        y = jnp.roll(y, (sd, sh, sw), axis=(2, 3, 4))
    return y


if __name__ == "__main__":
    embed_dim = 32
    num_heads = 4
    window_size = (2, 2, 2)
    shift_size = (1, 1, 1)            # PyTorch default: ws // 2
    B, C, D, H, W = 2, embed_dim, 8, 8, 8   # NW = 128 windows, N = 8 tokens

    key = jax.random.PRNGKey(0)
    k_x, k_p = jax.random.split(key)
    x = jax.random.normal(k_x, (B, C, D, H, W), jnp.float32)
    params = init_params(k_p, embed_dim)

    out = spiking_shifted_window_attention_3d(
        x, params, window_size=window_size, shift_size=shift_size,
        num_heads=num_heads)
    out = jax.block_until_ready(out)

    ref = reference_forward(x, params, window_size=window_size,
                            shift_size=shift_size, num_heads=num_heads)
    ref = jax.block_until_ready(ref)

    assert out.shape == (B, C, D, H, W)
    assert out.dtype == jnp.bfloat16
    # Spikes are {0,1}. bf16 MXU/token operands can flip a tiny fraction of
    # threshold-boundary elements vs the f32 reference; allow <1% flips.
    flip_rate = float(jnp.mean(jnp.abs(out.astype(jnp.float32) - ref)))
    assert flip_rate < 1e-2, flip_rate

    print("KERNEL_OK")
</pallas_src>

<mosaic_0001>
module attributes {stable_mosaic.version = 11 : i64} {
  func.func @_swin_attn_kernel(%arg0: i32, %arg1: memref<32x128xbf16, #tpu.memory_space<vmem>>, %arg2: memref<96x32xbf16, #tpu.memory_space<vmem>>, %arg3: memref<96x1xf32, #tpu.memory_space<vmem>>, %arg4: memref<32x32xbf16, #tpu.memory_space<vmem>>, %arg5: memref<32x1xf32, #tpu.memory_space<vmem>>, %arg6: memref<32x1xf32, #tpu.memory_space<vmem>>, %arg7: memref<32x1xf32, #tpu.memory_space<vmem>>, %arg8: memref<128x128xf32, #tpu.memory_space<vmem>>, %arg9: memref<32x128xbf16, #tpu.memory_space<vmem>>) attributes {dimension_semantics = [#tpu.dimension_semantics<parallel>], iteration_bounds = array<i64: 8>, scalar_prefetch = 0 : i64, scratch_operands = 0 : i64, tpu.core_type = #tpu.core_type<tc>, window_params = [{transform_indices = @transform_0, window_bounds = array<i64: 32, 128>}, {pipeline_mode = #tpu.pipeline_mode<synchronous>, transform_indices = @transform_1, window_bounds = array<i64: 96, 32>}, {pipeline_mode = #tpu.pipeline_mode<synchronous>, transform_indices = @transform_2, window_bounds = array<i64: 96, 1>}, {pipeline_mode = #tpu.pipeline_mode<synchronous>, transform_indices = @transform_3, window_bounds = array<i64: 32, 32>}, {pipeline_mode = #tpu.pipeline_mode<synchronous>, transform_indices = @transform_4, window_bounds = array<i64: 32, 1>}, {pipeline_mode = #tpu.pipeline_mode<synchronous>, transform_indices = @transform_5, window_bounds = array<i64: 32, 1>}, {pipeline_mode = #tpu.pipeline_mode<synchronous>, transform_indices = @transform_6, window_bounds = array<i64: 32, 1>}, {pipeline_mode = #tpu.pipeline_mode<synchronous>, transform_indices = @transform_7, window_bounds = array<i64: 128, 128>}, {transform_indices = @transform_8, window_bounds = array<i64: 32, 128>}]} {
    %c0 = arith.constant 0 : index
    %c0_0 = arith.constant 0 : index
    %0 = vector.load %arg1[%c0, %c0_0] : memref<32x128xbf16, #tpu.memory_space<vmem>>, vector<32x128xbf16>
    %1 = arith.extf %0 : vector<32x128xbf16> to vector<32x128xf32>
    %c0_1 = arith.constant 0 : index
    %c0_2 = arith.constant 0 : index
    %2 = vector.load %arg2[%c0_1, %c0_2] : memref<96x32xbf16, #tpu.memory_space<vmem>>, vector<96x32xbf16>
    %cst = arith.constant dense<0.000000e+00> : vector<96x128xf32>
    %3 = tpu.matmul %2, %0, %cst {dimension_numbers = #tpu.dot_dimension_numbers<[1], [0], [0], [1], [0, 0, 1, 1], [], []>} : vector<96x32xbf16>, vector<32x128xbf16>, vector<96x128xf32> -> vector<96x128xf32>
    %c0_3 = arith.constant 0 : index
    %c0_4 = arith.constant 0 : index
    %4 = vector.load %arg3[%c0_3, %c0_4] : memref<96x1xf32, #tpu.memory_space<vmem>>, vector<96x1xf32>
    %5 = vector.broadcast %4 : vector<96x1xf32> to vector<96x128xf32>
    %6 = arith.addf %3, %5 : vector<96x128xf32>
    %c0_5 = arith.constant 0 : index
    %c0_6 = arith.constant 0 : index
    %7 = vector.load %arg8[%c0_5, %c0_6] : memref<128x128xf32, #tpu.memory_space<vmem>>, vector<128x128xf32>
    %c0_7 = arith.constant 0 : index
    %c0_8 = arith.constant 0 : index
    %8 = vector.load %arg4[%c0_7, %c0_8] : memref<32x32xbf16, #tpu.memory_space<vmem>>, vector<32x32xbf16>
    %cst_9 = arith.constant 0.000000e+00 : f32
    %9 = vector.broadcast %cst_9 : f32 to vector<32x128xf32>
    %10 = vector.extract_strided_slice %6 {offsets = [0, 0], sizes = [8, 128], strides = [1, 1]} : vector<96x128xf32> to vector<8x128xf32>
    %11 = arith.truncf %10 : vector<8x128xf32> to vector<8x128xbf16>
    %12 = vector.extract_strided_slice %6 {offsets = [32, 0], sizes = [8, 128], strides = [1, 1]} : vector<96x128xf32> to vector<8x128xf32>
    %13 = arith.truncf %12 : vector<8x128xf32> to vector<8x128xbf16>
    %14 = vector.extract_strided_slice %6 {offsets = [64, 0], sizes = [8, 128], strides = [1, 1]} : vector<96x128xf32> to vector<8x128xf32>
    %15 = arith.truncf %14 : vector<8x128xf32> to vector<8x128xbf16>
    %cst_10 = arith.constant dense<0.000000e+00> : vector<128x128xf32>
    %16 = tpu.matmul %11, %13, %cst_10 {dimension_numbers = #tpu.dot_dimension_numbers<[0], [0], [1], [1], [0, 1, 1, 1], [], []>} : vector<8x128xbf16>, vector<8x128xbf16>, vector<128x128xf32> -> vector<128x128xf32>
    %17 = arith.addf %16, %7 : vector<128x128xf32>
    %cst_11 = arith.constant dense<0xFF800000> : vector<128xf32>
    %18 = vector.multi_reduction <maximumf>, %17, %cst_11 [1] : vector<128x128xf32> to vector<128xf32>
    %19 = vector.shape_cast %18 : vector<128xf32> to vector<128x1xf32>
    %20 = vector.broadcast %19 : vector<128x1xf32> to vector<128x128xf32>
    %21 = arith.subf %17, %20 : vector<128x128xf32>
    %22 = math.exp %21 : vector<128x128xf32>
    %cst_12 = arith.constant dense<0.000000e+00> : vector<128xf32>
    %23 = vector.multi_reduction <add>, %22, %cst_12 [1] : vector<128x128xf32> to vector<128xf32>
    %24 = vector.shape_cast %23 : vector<128xf32> to vector<128x1xf32>
    %25 = tpu.reciprocal %24 {approx = true} : vector<128x1xf32> -> vector<128x1xf32>
    %26 = vector.broadcast %25 : vector<128x1xf32> to vector<128x128xf32>
    %27 = arith.mulf %22, %26 : vector<128x128xf32>
    %28 = arith.truncf %27 : vector<128x128xf32> to vector<128x128xbf16>
    %cst_13 = arith.constant dense<0.000000e+00> : vector<8x128xf32>
    %29 = tpu.matmul %15, %28, %cst_13 {dimension_numbers = #tpu.dot_dimension_numbers<[1], [1], [0], [0], [0, 0, 1, 0], [], []>} : vector<8x128xbf16>, vector<128x128xbf16>, vector<8x128xf32> -> vector<8x128xf32>
    %30 = vector.extract_strided_slice %8 {offsets = [0, 0], sizes = [32, 8], strides = [1, 1]} : vector<32x32xbf16> to vector<32x8xbf16>
    %31 = arith.truncf %29 : vector<8x128xf32> to vector<8x128xbf16>
    %cst_14 = arith.constant dense<0.000000e+00> : vector<32x128xf32>
    %32 = tpu.matmul %30, %31, %cst_14 {dimension_numbers = #tpu.dot_dimension_numbers<[1], [0], [0], [1], [0, 0, 1, 1], [], []>} : vector<32x8xbf16>, vector<8x128xbf16>, vector<32x128xf32> -> vector<32x128xf32>
    %33 = arith.addf %9, %32 : vector<32x128xf32>
    %34 = vector.extract_strided_slice %6 {offsets = [8, 0], sizes = [8, 128], strides = [1, 1]} : vector<96x128xf32> to vector<8x128xf32>
    %35 = arith.truncf %34 : vector<8x128xf32> to vector<8x128xbf16>
    %36 = vector.extract_strided_slice %6 {offsets = [40, 0], sizes = [8, 128], strides = [1, 1]} : vector<96x128xf32> to vector<8x128xf32>
    %37 = arith.truncf %36 : vector<8x128xf32> to vector<8x128xbf16>
    %38 = vector.extract_strided_slice %6 {offsets = [72, 0], sizes = [8, 128], strides = [1, 1]} : vector<96x128xf32> to vector<8x128xf32>
    %39 = arith.truncf %38 : vector<8x128xf32> to vector<8x128xbf16>
    %cst_15 = arith.constant dense<0.000000e+00> : vector<128x128xf32>
    %40 = tpu.matmul %35, %37, %cst_15 {dimension_numbers = #tpu.dot_dimension_numbers<[0], [0], [1], [1], [0, 1, 1, 1], [], []>} : vector<8x128xbf16>, vector<8x128xbf16>, vector<128x128xf32> -> vector<128x128xf32>
    %41 = arith.addf %40, %7 : vector<128x128xf32>
    %cst_16 = arith.constant dense<0xFF800000> : vector<128xf32>
    %42 = vector.multi_reduction <maximumf>, %41, %cst_16 [1] : vector<128x128xf32> to vector<128xf32>
    %43 = vector.shape_cast %42 : vector<128xf32> to vector<128x1xf32>
    %44 = vector.broadcast %43 : vector<128x1xf32> to vector<128x128xf32>
    %45 = arith.subf %41, %44 : vector<128x128xf32>
    %46 = math.exp %45 : vector<128x128xf32>
    %cst_17 = arith.constant dense<0.000000e+00> : vector<128xf32>
    %47 = vector.multi_reduction <add>, %46, %cst_17 [1] : vector<128x128xf32> to vector<128xf32>
    %48 = vector.shape_cast %47 : vector<128xf32> to vector<128x1xf32>
    %49 = tpu.reciprocal %48 {approx = true} : vector<128x1xf32> -> vector<128x1xf32>
    %50 = vector.broadcast %49 : vector<128x1xf32> to vector<128x128xf32>
    %51 = arith.mulf %46, %50 : vector<128x128xf32>
    %52 = arith.truncf %51 : vector<128x128xf32> to vector<128x128xbf16>
    %cst_18 = arith.constant dense<0.000000e+00> : vector<8x128xf32>
    %53 = tpu.matmul %39, %52, %cst_18 {dimension_numbers = #tpu.dot_dimension_numbers<[1], [1], [0], [0], [0, 0, 1, 0], [], []>} : vector<8x128xbf16>, vector<128x128xbf16>, vector<8x128xf32> -> vector<8x128xf32>
    %54 = vector.extract_strided_slice %8 {offsets = [0, 8], sizes = [32, 8], strides = [1, 1]} : vector<32x32xbf16> to vector<32x8xbf16>
    %55 = arith.truncf %53 : vector<8x128xf32> to vector<8x128xbf16>
    %cst_19 = arith.constant dense<0.000000e+00> : vector<32x128xf32>
    %56 = tpu.matmul %54, %55, %cst_19 {dimension_numbers = #tpu.dot_dimension_numbers<[1], [0], [0], [1], [0, 0, 1, 1], [], []>} : vector<32x8xbf16>, vector<8x128xbf16>, vector<32x128xf32> -> vector<32x128xf32>
    %57 = arith.addf %33, %56 : vector<32x128xf32>
    %58 = vector.extract_strided_slice %6 {offsets = [16, 0], sizes = [8, 128], strides = [1, 1]} : vector<96x128xf32> to vector<8x128xf32>
    %59 = arith.truncf %58 : vector<8x128xf32> to vector<8x128xbf16>
    %60 = vector.extract_strided_slice %6 {offsets = [48, 0], sizes = [8, 128], strides = [1, 1]} : vector<96x128xf32> to vector<8x128xf32>
    %61 = arith.truncf %60 : vector<8x128xf32> to vector<8x128xbf16>
    %62 = vector.extract_strided_slice %6 {offsets = [80, 0], sizes = [8, 128], strides = [1, 1]} : vector<96x128xf32> to vector<8x128xf32>
    %63 = arith.truncf %62 : vector<8x128xf32> to vector<8x128xbf16>
    %cst_20 = arith.constant dense<0.000000e+00> : vector<128x128xf32>
    %64 = tpu.matmul %59, %61, %cst_20 {dimension_numbers = #tpu.dot_dimension_numbers<[0], [0], [1], [1], [0, 1, 1, 1], [], []>} : vector<8x128xbf16>, vector<8x128xbf16>, vector<128x128xf32> -> vector<128x128xf32>
    %65 = arith.addf %64, %7 : vector<128x128xf32>
    %cst_21 = arith.constant dense<0xFF800000> : vector<128xf32>
    %66 = vector.multi_reduction <maximumf>, %65, %cst_21 [1] : vector<128x128xf32> to vector<128xf32>
    %67 = vector.shape_cast %66 : vector<128xf32> to vector<128x1xf32>
    %68 = vector.broadcast %67 : vector<128x1xf32> to vector<128x128xf32>
    %69 = arith.subf %65, %68 : vector<128x128xf32>
    %70 = math.exp %69 : vector<128x128xf32>
    %cst_22 = arith.constant dense<0.000000e+00> : vector<128xf32>
    %71 = vector.multi_reduction <add>, %70, %cst_22 [1] : vector<128x128xf32> to vector<128xf32>
    %72 = vector.shape_cast %71 : vector<128xf32> to vector<128x1xf32>
    %73 = tpu.reciprocal %72 {approx = true} : vector<128x1xf32> -> vector<128x1xf32>
    %74 = vector.broadcast %73 : vector<128x1xf32> to vector<128x128xf32>
    %75 = arith.mulf %70, %74 : vector<128x128xf32>
    %76 = arith.truncf %75 : vector<128x128xf32> to vector<128x128xbf16>
    %cst_23 = arith.constant dense<0.000000e+00> : vector<8x128xf32>
    %77 = tpu.matmul %63, %76, %cst_23 {dimension_numbers = #tpu.dot_dimension_numbers<[1], [1], [0], [0], [0, 0, 1, 0], [], []>} : vector<8x128xbf16>, vector<128x128xbf16>, vector<8x128xf32> -> vector<8x128xf32>
    %78 = vector.extract_strided_slice %8 {offsets = [0, 16], sizes = [32, 8], strides = [1, 1]} : vector<32x32xbf16> to vector<32x8xbf16>
    %79 = arith.truncf %77 : vector<8x128xf32> to vector<8x128xbf16>
    %cst_24 = arith.constant dense<0.000000e+00> : vector<32x128xf32>
    %80 = tpu.matmul %78, %79, %cst_24 {dimension_numbers = #tpu.dot_dimension_numbers<[1], [0], [0], [1], [0, 0, 1, 1], [], []>} : vector<32x8xbf16>, vector<8x128xbf16>, vector<32x128xf32> -> vector<32x128xf32>
    %81 = arith.addf %57, %80 : vector<32x128xf32>
    %82 = vector.extract_strided_slice %6 {offsets = [24, 0], sizes = [8, 128], strides = [1, 1]} : vector<96x128xf32> to vector<8x128xf32>
    %83 = arith.truncf %82 : vector<8x128xf32> to vector<8x128xbf16>
    %84 = vector.extract_strided_slice %6 {offsets = [56, 0], sizes = [8, 128], strides = [1, 1]} : vector<96x128xf32> to vector<8x128xf32>
    %85 = arith.truncf %84 : vector<8x128xf32> to vector<8x128xbf16>
    %86 = vector.extract_strided_slice %6 {offsets = [88, 0], sizes = [8, 128], strides = [1, 1]} : vector<96x128xf32> to vector<8x128xf32>
    %87 = arith.truncf %86 : vector<8x128xf32> to vector<8x128xbf16>
    %cst_25 = arith.constant dense<0.000000e+00> : vector<128x128xf32>
    %88 = tpu.matmul %83, %85, %cst_25 {dimension_numbers = #tpu.dot_dimension_numbers<[0], [0], [1], [1], [0, 1, 1, 1], [], []>} : vector<8x128xbf16>, vector<8x128xbf16>, vector<128x128xf32> -> vector<128x128xf32>
    %89 = arith.addf %88, %7 : vector<128x128xf32>
    %cst_26 = arith.constant dense<0xFF800000> : vector<128xf32>
    %90 = vector.multi_reduction <maximumf>, %89, %cst_26 [1] : vector<128x128xf32> to vector<128xf32>
    %91 = vector.shape_cast %90 : vector<128xf32> to vector<128x1xf32>
    %92 = vector.broadcast %91 : vector<128x1xf32> to vector<128x128xf32>
    %93 = arith.subf %89, %92 : vector<128x128xf32>
    %94 = math.exp %93 : vector<128x128xf32>
    %cst_27 = arith.constant dense<0.000000e+00> : vector<128xf32>
    %95 = vector.multi_reduction <add>, %94, %cst_27 [1] : vector<128x128xf32> to vector<128xf32>
    %96 = vector.shape_cast %95 : vector<128xf32> to vector<128x1xf32>
    %97 = tpu.reciprocal %96 {approx = true} : vector<128x1xf32> -> vector<128x1xf32>
    %98 = vector.broadcast %97 : vector<128x1xf32> to vector<128x128xf32>
    %99 = arith.mulf %94, %98 : vector<128x128xf32>
    %100 = arith.truncf %99 : vector<128x128xf32> to vector<128x128xbf16>
    %cst_28 = arith.constant dense<0.000000e+00> : vector<8x128xf32>
    %101 = tpu.matmul %87, %100, %cst_28 {dimension_numbers = #tpu.dot_dimension_numbers<[1], [1], [0], [0], [0, 0, 1, 0], [], []>} : vector<8x128xbf16>, vector<128x128xbf16>, vector<8x128xf32> -> vector<8x128xf32>
    %102 = vector.extract_strided_slice %8 {offsets = [0, 24], sizes = [32, 8], strides = [1, 1]} : vector<32x32xbf16> to vector<32x8xbf16>
    %103 = arith.truncf %101 : vector<8x128xf32> to vector<8x128xbf16>
    %cst_29 = arith.constant dense<0.000000e+00> : vector<32x128xf32>
    %104 = tpu.matmul %102, %103, %cst_29 {dimension_numbers = #tpu.dot_dimension_numbers<[1], [0], [0], [1], [0, 0, 1, 1], [], []>} : vector<32x8xbf16>, vector<8x128xbf16>, vector<32x128xf32> -> vector<32x128xf32>
    %105 = arith.addf %81, %104 : vector<32x128xf32>
    %c0_30 = arith.constant 0 : index
    %c0_31 = arith.constant 0 : index
    %106 = vector.load %arg5[%c0_30, %c0_31] : memref<32x1xf32, #tpu.memory_space<vmem>>, vector<32x1xf32>
    %107 = vector.broadcast %106 : vector<32x1xf32> to vector<32x128xf32>
    %108 = arith.addf %105, %107 : vector<32x128xf32>
    %109 = arith.addf %108, %1 : vector<32x128xf32>
    %cst_32 = arith.constant dense<0.000000e+00> : vector<128xf32>
    %110 = vector.multi_reduction <add>, %109, %cst_32 [0] : vector<32x128xf32> to vector<128xf32>
    %111 = vector.shape_cast %110 : vector<128xf32> to vector<1x128xf32>
    %cst_33 = arith.constant 3.200000e+01 : f32
    %112 = vector.broadcast %cst_33 : f32 to vector<1x128xf32>
    %113 = arith.divf %111, %112 : vector<1x128xf32>
    %114 = vector.broadcast %113 : vector<1x128xf32> to vector<32x128xf32>
    %115 = arith.subf %109, %114 : vector<32x128xf32>
    %116 = arith.mulf %115, %115 : vector<32x128xf32>
    %cst_34 = arith.constant dense<0.000000e+00> : vector<128xf32>
    %117 = vector.multi_reduction <add>, %116, %cst_34 [0] : vector<32x128xf32> to vector<128xf32>
    %118 = vector.shape_cast %117 : vector<128xf32> to vector<1x128xf32>
    %cst_35 = arith.constant 3.200000e+01 : f32
    %119 = vector.broadcast %cst_35 : f32 to vector<1x128xf32>
    %120 = arith.divf %118, %119 : vector<1x128xf32>
    %121 = vector.broadcast %113 : vector<1x128xf32> to vector<32x128xf32>
    %122 = arith.subf %109, %121 : vector<32x128xf32>
    %cst_36 = arith.constant 9.99999974E-6 : f32
    %123 = vector.broadcast %cst_36 : f32 to vector<1x128xf32>
    %124 = arith.addf %120, %123 : vector<1x128xf32>
    %125 = math.rsqrt %124 : vector<1x128xf32>
    %126 = vector.broadcast %125 : vector<1x128xf32> to vector<32x128xf32>
    %127 = arith.mulf %122, %126 : vector<32x128xf32>
    %c0_37 = arith.constant 0 : index
    %c0_38 = arith.constant 0 : index
    %128 = vector.load %arg6[%c0_37, %c0_38] : memref<32x1xf32, #tpu.memory_space<vmem>>, vector<32x1xf32>
    %129 = vector.broadcast %128 : vector<32x1xf32> to vector<32x128xf32>
    %130 = arith.mulf %127, %129 : vector<32x128xf32>
    %c0_39 = arith.constant 0 : index
    %c0_40 = arith.constant 0 : index
    %131 = vector.load %arg7[%c0_39, %c0_40] : memref<32x1xf32, #tpu.memory_space<vmem>>, vector<32x1xf32>
    %132 = vector.broadcast %131 : vector<32x1xf32> to vector<32x128xf32>
    %133 = arith.addf %130, %132 : vector<32x128xf32>
    %cst_41 = arith.constant 5.000000e-01 : f32
    %134 = vector.broadcast %cst_41 : f32 to vector<32x128xf32>
    %135 = arith.mulf %133, %134 : vector<32x128xf32>
    %cst_42 = arith.constant 1.000000e+00 : f32
    %136 = vector.broadcast %cst_42 : f32 to vector<32x128xf32>
    %137 = arith.cmpf oge, %135, %136 : vector<32x128xf32>
    %138 = arith.extui %137 : vector<32x128xi1> to vector<32x128xi32>
    %139 = arith.sitofp %138 : vector<32x128xi32> to vector<32x128xf32>
    %140 = arith.truncf %139 : vector<32x128xf32> to vector<32x128xbf16>
    %c0_43 = arith.constant 0 : index
    %c0_44 = arith.constant 0 : index
    %141 = vector.load %arg9[%c0_43, %c0_44] : memref<32x128xbf16, #tpu.memory_space<vmem>>, vector<32x128xbf16>
    tpu.vector_store %arg9[%c0_43, %c0_44], %140 {strides = array<i32>} : memref<32x128xbf16, #tpu.memory_space<vmem>>, vector<32x128xbf16>,
    return
  }
  func.func @transform_0(%arg0: i32) -> (i32, i32) {
    %c0_i32 = arith.constant 0 : i32
    %c0_i32_0 = arith.constant 0 : i32
    return %c0_i32, %arg0 : i32, i32
  }
  func.func @transform_1(%arg0: i32) -> (i32, i32) {
    %c0_i32 = arith.constant 0 : i32
    %c0_i32_0 = arith.constant 0 : i32
    %c0_i32_1 = arith.constant 0 : i32
    return %c0_i32, %c0_i32_0 : i32, i32
  }
  func.func @transform_2(%arg0: i32) -> (i32, i32) {
    %c0_i32 = arith.constant 0 : i32
    %c0_i32_0 = arith.constant 0 : i32
    %c0_i32_1 = arith.constant 0 : i32
    return %c0_i32, %c0_i32_0 : i32, i32
  }
  func.func @transform_3(%arg0: i32) -> (i32, i32) {
    %c0_i32 = arith.constant 0 : i32
    %c0_i32_0 = arith.constant 0 : i32
    %c0_i32_1 = arith.constant 0 : i32
    return %c0_i32, %c0_i32_0 : i32, i32
  }
  func.func @transform_4(%arg0: i32) -> (i32, i32) {
    %c0_i32 = arith.constant 0 : i32
    %c0_i32_0 = arith.constant 0 : i32
    %c0_i32_1 = arith.constant 0 : i32
    return %c0_i32, %c0_i32_0 : i32, i32
  }
  func.func @transform_5(%arg0: i32) -> (i32, i32) {
    %c0_i32 = arith.constant 0 : i32
    %c0_i32_0 = arith.constant 0 : i32
    %c0_i32_1 = arith.constant 0 : i32
    return %c0_i32, %c0_i32_0 : i32, i32
  }
  func.func @transform_6(%arg0: i32) -> (i32, i32) {
    %c0_i32 = arith.constant 0 : i32
    %c0_i32_0 = arith.constant 0 : i32
    %c0_i32_1 = arith.constant 0 : i32
    return %c0_i32, %c0_i32_0 : i32, i32
  }
  func.func @transform_7(%arg0: i32) -> (i32, i32) {
    %c0_i32 = arith.constant 0 : i32
    %c0_i32_0 = arith.constant 0 : i32
    %c0_i32_1 = arith.constant 0 : i32
    return %c0_i32, %c0_i32_0 : i32, i32
  }
  func.func @transform_8(%arg0: i32) -> (i32, i32) {
    %c0_i32 = arith.constant 0 : i32
    %c0_i32_0 = arith.constant 0 : i32
    return %c0_i32, %arg0 : i32, i32
  }
}

</mosaic_0001>

<bundles_post_ra>
// kernel: spiking_shifted_window_attention_3d.1
= control target key start
LH: loop header
LB: loop body
LE: loop exit
PB: predicated region body
PF: predicated region fallthrough
CT: control target
= control target key end

     0   :  { %s3272_s27 = smov 0   ;;  %s3274_s28 = smov 0   ;;  %s4289_s0 = inlined_call_operand.vmem [shape: bf16[32,1024], index: 0, kind: input, shape index: {}]   ;;  %s4290_s1 = inlined_call_operand.vmem [shape: bf16[96,32], index: 1, kind: input, shape index: {}]   ;;  %s4291_s2 = inlined_call_operand.vmem [shape: f32[96,1], index: 2, kind: input, shape index: {}]   ;;  %s4292_s3 = inlined_call_operand.vmem [shape: bf16[32,32], index: 3, kind: input, shape index: {}]   ;;  %s4293_s4 = inlined_call_operand.vmem [shape: f32[32,1], index: 4, kind: input, shape index: {}]   ;;  %s4294_s5 = inlined_call_operand.vmem [shape: f32[32,1], index: 5, kind: input, shape index: {}]   ;;  %s4295_s6 = inlined_call_operand.vmem [shape: f32[32,1], index: 6, kind: input, shape index: {}]   ;;  %s4296_s7 = inlined_call_operand.vmem [shape: f32[128,128], index: 7, kind: input, shape index: {}]   ;;  %s4297_s8 = inlined_call_operand.vmem [shape: bf16[32,1024], index: 8, kind: output, shape index: {}]  }
   0x1   :  { %s3276_s29 = smov 0  }
   0x2 LB: > { %s2495_s30 = sadd.s32 4294967295, %s3219_s29   ;;  %s3289_s9 = sadd.s32 1, %s3219_s29   ;;  %s3219_s29 = sphi %s3276_s29, %s4301_s29   ;;  %s3215_s28 = sphi %s3274_s28, %s4300_s28   ;;  %s3211_s27 = sphi %s3272_s27, %s4299_s27  }
   0x3   : > { %s22_s10 = ssub.s32 %s3219_s29, %s3289_s9  ;;  %s25_s11 = sadd.s32 1, %s3215_s28 }
   0x4   : > { %p23_p0 = scmp.eq.s32.totalorder %s22_s10, 0  ;;  %p32_p1 = scmp.ne.s32.totalorder %s3215_s28, %s3211_s27 }
   0x5   : > { %p33_p2 = scmp.eq.s32.totalorder %s3219_s29, 0  ;;  %p209_p3 = scmp.eq.s32.totalorder %s2495_s30, 7 }
   0x6   : > { %s3300_s12 = scalar_select %p23_p0, %s3215_s28, %s25_s11  }
   0x7   : > { %p34_p4 = por %p33_p2, %p32_p1  ;;  %p3302_p5 = por %p209_p3, %p32_p1 }
   0x8   : > { %p2498_p6 = scmp.ge.s32.totalorder %s3219_s29, 8 }
   0xa   : > { %252 = sbr.rel (%p2498_p6) target bundleno = 23 (0x17), region = 44 }
   0xf   : > { %255 = sbr.rel (!%p34_p4) target bundleno = 23 (0x17), region = 48  ;;  %s257_s14 = sand.u32 (%p34_p4), 1, %s3215_s28  }
  0x10   : > { %s2500_s15 = sshll.u32 (%p34_p4), %s3219_s29, 2  ;;  %s2499_s16 = sshll.u32 (%p34_p4), %s257_s14, 4 }
  0x11   : > { %s261_s19 = scalar_lea.vmem (%p34_p4), %s4289_s0, %s2500_s15  ;;  %s259_s20 = scalar_lea.vmem (%p34_p4), [#allocation2], %s2499_s16 }
  0x12   : > { %v278_v0 = vld [vmem:[%s261_s19] sm:$0xf] (%p34_p4) }
  0x13   : > { %v280_v1 = vld [vmem:[%s261_s19 + $0x20] sm:$0xf] (%p34_p4)  ;;  %279 = vst [vmem:[%s259_s20] sm:$0xf] (%p34_p4), %v278_v0 }
  0x14   : > { %281 = vst [vmem:[%s259_s20 + $0x4] sm:$0xf] %v280_v1  ;;  %v282_v2 = vld [vmem:[%s261_s19 + $0x40] sm:$0xf] }
  0x15   : > { %v284_v3 = vld [vmem:[%s261_s19 + $0x60] sm:$0xf]  ;;  %283 = vst [vmem:[%s259_s20 + $0x8] sm:$0xf] %v282_v2 }
  0x16   : > { %285 = vst [vmem:[%s259_s20 + $0xc] sm:$0xf] %v284_v3 }
  0x17 PF: > { %p2501_p7 = scmp.ge.s32.totalorder %s3219_s29, 1  ;;  %p316_p8 = scmp.lt.s32.totalorder %s3219_s29, 9 }
  0x19   : > { %p317_p9 = pnand %p2501_p7, %p316_p8 }
  0x1a   : > { %s323_s21 = sand.u32 (!%p317_p9), 1, %s3211_s27   ;;  %s3223_s16 = smov (!%p317_p9), 120  }
  0x1b   : > { %320 = sbr.rel (%p317_p9) target bundleno = 2267 (0x8db), region = 89  ;;  %s3318_s24 = sshll.u32 (!%p317_p9), %s323_s21, 4 }
  0x1c   : > { %s3325_s10 = scalar_lea.vmem (!%p317_p9), [#allocation2], %s3318_s24  ;;  %s3225_s17 = smov (!%p317_p9), 112  }
  0x1d   : > { %s3226_s18 = smov (!%p317_p9), 104  }
  0x20   : > { %v2909_v4 = vld [vmem:[%s4290_s1] sm:$0xff]   ;;  %vm490_vm0 = vcmask 261120   ;;  %v377_v5 = vld [vmem:[%s4291_s2 + $0x8] sm:$0xff]  ;;  %v3221_v8 = vmov 0   ;;  %v2911_v13 = vld [vmem:[%s4290_s1 + $0x10] sm:$0xff]   ;;  %vm654_vm1 = vcmask 1043456  }
  0x21   : > { %2679 = vmatprep.mubr.msk.bf16.mxu0 %vm490_vm0, %v2909_v4  ;;  %v358_v6 = vld [vmem:[%s3325_s10 + $0x8] sm:$0xff]   ;;  %v356_v7 = vld [vmem:[%s3325_s10] sm:$0xff]   ;;  %2905 = vset.pattern.permute.xlu0 %v3221_v8  ;;  %vm629_vm2 = vcmask 64512   ;;  %vm3224_vm3 = vmmov 0  }
  0x22   : > { %2906 = vset.pattern.permute.xlu1 %v3221_v8  ;;  %395 = vperm.xlu0 %2905, %v377_v5   ;;  %v376_v9 = vld [vmem:[%s4291_s2] sm:$0xff]  ;;  %v381_v10 = vld [vmem:[%s4291_s2 + $0x28] sm:$0xff]  ;;  %v2912_v14 = vld [vmem:[%s4290_s1 + $0x18] sm:$0xff]  }
  0x23   : > { %2675 = vmatprep.subr.bf16.mxu0 %v358_v6  ;;  %415 = vperm.xlu1 %2906, %v381_v10   ;;  %v380_v11 = vld [vmem:[%s4291_s2 + $0x20] sm:$0xff]  ;;  %v2910_v12 = vld [vmem:[%s4290_s1 + $0x8] sm:$0xff]  }
  0x24   : > { %2676 = vmatpush3.bf16.msra.mxu0 %v358_v6  ;;  %v2913_v15 = vld [vmem:[%s4290_s1 + $0x20] sm:$0xff]   ;;  %v2914_v16 = vld [vmem:[%s4290_s1 + $0x28] sm:$0xff]  }
  0x25   : > { %2677 = vmatprep.subr.bf16.mxu0 %v356_v7 }
  0x26   : > { %390 = vperm.xlu0 %2905, %v376_v9  }
  0x27   : > { %410 = vperm.xlu1 %2906, %v380_v11  }
  0x28   : > { %2678 = vmatpush3.bf16.msra.mxu0 %v356_v7 }
  0x2b   : > { %2680 = vmatmul.mubr.msk.bf16.vlgmr.msra.gmra.mxu0 %vm490_vm0, %v2910_v12 }
  0x2c   : > { %2683 = vmatprep.mubr.msk.bf16.mxu0 %vm490_vm0, %v2911_v13 }
  0x33   : > { %2684 = vmatmul.mubr.msk.bf16.gmra.mxu0 %vm490_vm0, %v2912_v14 }
  0x34   : > { %2687 = vmatprep.mubr.msk.bf16.mxu0 %vm490_vm0, %v2913_v15 }
  0x3b   : > { %2688 = vmatmul.mubr.msk.bf16.gmra.mxu0 %vm490_vm0, %v2914_v16 }
  0x9d   : > { %v396_v17 = vpop.permute.xlu0 %395 }
  0x9e   : > { %v416_v21 = vpop.permute.xlu1 %415 }
  0xa1   : > { %v391_v19 = vpop.permute.xlu0 %390 }
  0xa2   : > { %v411_v28 = vpop.permute.xlu1 %410 }
  0xeb   : > { %v3358_v18 = vpop.f32.mrf.mxu0 }
  0xed   : > { %v543_v20 = vpop.f32.mrf.mxu0 }
  0xee   : > { %v544_v22 = vadd.f32 %v543_v20, %v391_v19  ;;  %v604_v19 = vld [vmem:[%s4296_s7 + $0x70] sm:$0xff] }
  0xef   : > { %v3360_v23 = vpop.f32.mrf.mxu0 }
  0xf0   : > { %v610_v24 = vpack.c.bf16 %v544_v22, %v544_v22 }
  0xf1   : > { %v546_v25 = vpop.f32.mrf.mxu0 }
  0xf2   : > { %v547_v26 = vadd.f32 %v546_v25, %v396_v17  ;;  %613 = vxpose.xlu1.c.b16.start.end [1/1] (short) %v610_v24, 128  ;;  %v605_v25 = vld [vmem:[%s4296_s7 + $0x78] sm:$0xff] }
  0xf3   : > { %v3362_v27 = vpop.f32.mrf.mxu0 }
  0xf4   : > { %v948_v29 = vpack.c.bf16 %v547_v26, %v547_v26 }
  0xf5   : > { %v559_v30 = vpop.f32.mrf.mxu0 }
  0xf6   : > { %951 = vxpose.xlu0.c.b16.start.end [1/1] (short) %v948_v29, 128  ;;  %v560_v31 = vadd.f32 %v559_v30, %v411_v28 }
  0xf7   : > { %v3364_v32 = vpop.f32.mrf.mxu0 }
  0xf8   : > { %v611_v33 = vpack.c.bf16 %v560_v31, %v560_v31 }
  0xf9   : > { %v562_v34 = vpop.f32.mrf.mxu0 }
  0xfa   : > { %v563_v35 = vadd.f32 %v562_v34, %v416_v21  ;;  %2867 = vmatprep.subr.msk.bf16.mxu1 %vm654_vm1, %v611_v33  ;;  %v656_v36 = vsel %vm654_vm1, %v611_v33, 0  ;;  %v602_v33 = vld [vmem:[%s4296_s7 + $0x60] sm:$0xff] }
  0xfb   : > { %2692 = vmatpush3.bf16.msra.mxu1 %v656_v36  ;;  %v3386_v55 = vpop.f32.mrf.mxu0 }
  0xfc   : > { %v949_v37 = vpack.c.bf16 %v563_v35, %v563_v35 }
  0xfd   : > { %v3388_v56 = vpop.f32.mrf.mxu0 }
  0xfe   : > { %v992_v38 = vsel %vm654_vm1, %v949_v37, 0  ;;  %2868 = vmatprep.subr.msk.bf16.mxu0 %vm654_vm1, %v949_v37 }
  0xff   : > { %2730 = vmatpush3.bf16.msra.mxu0 %v992_v38  ;;  %v3390_v57 = vpop.f32.mrf.mxu0  ;;  %v603_v38 = vld [vmem:[%s4296_s7 + $0x68] sm:$0xff] }
 0x101   : > { %v3394_v59 = vpop.f32.mrf.mxu0 }
 0x154   : > { %v621_v39 = vpop.trf.xlu1 }
 0x155   : > { %2693 = vmatprep.mubr.msk.bf16.mxu1 %vm629_vm2, %v621_v39 }
 0x158   : > { %v959_v40 = vpop.trf.xlu0  ;;  %v622_v41 = vpop.trf.xlu1 }
 0x159   : > { %2731 = vmatprep.mubr.msk.bf16.mxu0 %vm629_vm2, %v959_v40  ;;  %2694 = vmatmul.mubr.msk.bf16.vlgmr.msra.gmra.mxu1 %vm629_vm2, %v622_v41  ;;  %v600_v41 = vld [vmem:[%s4296_s7 + $0x50] sm:$0xff] }
 0x15c   : > { %v960_v42 = vpop.trf.xlu0  ;;  %v623_v43 = vpop.trf.xlu1 }
 0x15d   : > { %2732 = vmatmul.mubr.msk.bf16.vlgmr.msra.gmra.mxu0 %vm629_vm2, %v960_v42  ;;  %2697 = vmatprep.mubr.msk.bf16.mxu1 %vm629_vm2, %v623_v43 }
 0x160   : > { %v961_v44 = vpop.trf.xlu0  ;;  %v624_v45 = vpop.trf.xlu1 }
 0x161   : > { %2735 = vmatprep.mubr.msk.bf16.mxu0 %vm629_vm2, %v961_v44  ;;  %2698 = vmatmul.mubr.msk.bf16.gmra.mxu1 %vm629_vm2, %v624_v45  ;;  %v601_v45 = vld [vmem:[%s4296_s7 + $0x58] sm:$0xff] }
 0x164   : > { %v962_v46 = vpop.trf.xlu0  ;;  %v625_v47 = vpop.trf.xlu1 }
 0x165   : > { %2736 = vmatmul.mubr.msk.bf16.gmra.mxu0 %vm629_vm2, %v962_v46  ;;  %2701 = vmatprep.mubr.msk.bf16.mxu1 %vm629_vm2, %v625_v47 }
 0x168   : > { %v963_v48 = vpop.trf.xlu0  ;;  %v626_v49 = vpop.trf.xlu1 }
 0x169   : > { %2739 = vmatprep.mubr.msk.bf16.mxu0 %vm629_vm2, %v963_v48  ;;  %2702 = vmatmul.mubr.msk.bf16.gmra.mxu1 %vm629_vm2, %v626_v49  ;;  %v598_v48 = vld [vmem:[%s4296_s7 + $0x40] sm:$0xff] }
 0x16c   : > { %v964_v50 = vpop.trf.xlu0  ;;  %v627_v51 = vpop.trf.xlu1 }
 0x16d   : > { %2740 = vmatmul.mubr.msk.bf16.gmra.mxu0 %vm629_vm2, %v964_v50  ;;  %2705 = vmatprep.mubr.msk.bf16.mxu1 %vm629_vm2, %v627_v51  ;;  %v599_v51 = vld [vmem:[%s4296_s7 + $0x48] sm:$0xff] }
 0x170   : > { %v965_v52 = vpop.trf.xlu0  ;;  %v628_v53 = vpop.trf.xlu1 }
 0x171   : > { %2743 = vmatprep.mubr.msk.bf16.mxu0 %vm629_vm2, %v965_v52  ;;  %2706 = vmatmul.mubr.msk.bf16.gmra.mxu1 %vm629_vm2, %v628_v53 }
 0x174   : > { %v966_v54 = vpop.trf.xlu0 }
 0x175   : > { %2744 = vmatmul.mubr.msk.bf16.gmra.mxu0 %vm629_vm2, %v966_v54  ;;  %v596_v54 = vld [vmem:[%s4296_s7 + $0x30] sm:$0xff] }
 0x219   : > { %v3392_v58 = vpop.f32.mrf.mxu1 }
 0x21b   : > { %v3396_v60 = vpop.f32.mrf.mxu1 }
 0x21d   : > { %v3398_v61 = vpop.f32.mrf.mxu0  ;;  %v3400_v62 = vpop.f32.mrf.mxu1 }
 0x21f   : > { %v3402_v63 = vpop.f32.mrf.mxu0  ;;  %v3404_v0 = vpop.f32.mrf.mxu1 }
 0x221   : > { %v3406_v1 = vpop.f32.mrf.mxu0  ;;  %v3408_v2 = vpop.f32.mrf.mxu1 }
 0x223   : > { %v3410_v3 = vpop.f32.mrf.mxu0  ;;  %v3412_v4 = vpop.f32.mrf.mxu1 }
 0x225   : > { %v2737_v5 = vpop.f32.mrf.mxu0  ;;  %v3414_v6 = vpop.f32.mrf.mxu1 }
 0x227   : > { %v3416_v7 = vpop.f32.mrf.mxu0  ;;  %v3418_v8 = vpop.f32.mrf.mxu1 }
 0x229   : > { %v3420_v9 = vpop.f32.mrf.mxu0  ;;  %v2703_v10 = vpop.f32.mrf.mxu1 }
 0x22a   : > { %v3469_v46 = vadd.f32 %v2703_v10, %v600_v41  ;;  %v3496_v10 = vadd.f32 %v2737_v5, %v596_v54  ;;  %v594_v5 = vld [vmem:[%s4296_s7 + $0x20] sm:$0xff] }
 0x22b   : > { %v3422_v11 = vpop.f32.mrf.mxu0  ;;  %v724_v12 = vpop.f32.mrf.mxu1 }
 0x22c   : > { %v3487_v52 = vadd.f32 %v724_v12, %v598_v48  ;;  %v3506_v12 = vadd.f32 %v3408_v2, %v596_v54  ;;  %v595_v2 = vld [vmem:[%s4296_s7 + $0x28] sm:$0xff] }
 0x22d   : > { %v2741_v13 = vpop.f32.mrf.mxu0  ;;  %v2704_v14 = vpop.f32.mrf.mxu1 }
 0x22e   : > { %v3460_v43 = vadd.f32 %v2741_v13, %v600_v41  ;;  %v3478_v49 = vadd.f32 %v2704_v14, %v601_v45  ;;  %v597_v14 = vld [vmem:[%s4296_s7 + $0x38] sm:$0xff] }
 0x22f   : > { %v1060_v15 = vpop.f32.mrf.mxu0  ;;  %v727_v16 = vpop.f32.mrf.mxu1 }
 0x230   : > { %v3480_v50 = vadd.f32 %v1060_v15, %v598_v48  ;;  %v3498_v13 = vadd.f32 %v727_v16, %v599_v51  ;;  %v3509_v15 = vadd.f32 %v3420_v9, %v597_v14  ;;  %v3517_v16 = vadd.f32 %v3414_v6, %v597_v14  ;;  %v592_v6 = vld [vmem:[%s4296_s7 + $0x10] sm:$0xff] }
 0x231   : > { %v2742_v17 = vpop.f32.mrf.mxu0  ;;  %v2707_v21 = vpop.f32.mrf.mxu1  ;;  %v3528_v9 = vadd.f32 %v3412_v4, %v594_v5  ;;  %v593_v4 = vld [vmem:[%s4296_s7 + $0x18] sm:$0xff] }
 0x232   : > { %v3432_v28 = vadd.f32 %v2707_v21, %v604_v19  ;;  %v3471_v47 = vadd.f32 %v2742_v17, %v601_v45  ;;  %v3520_v17 = vadd.f32 %v3416_v7, %v594_v5  ;;  %v3539_v7 = vadd.f32 %v3398_v61, %v592_v6  ;;  %v590_v61 = vld [vmem:[%s4296_s7] sm:$0xff] }
 0x233   : > { %v1063_v20 = vpop.f32.mrf.mxu0  ;;  %v740_v29 = vpop.f32.mrf.mxu1  ;;  %v3553_v21 = vadd.f32 %v3406_v1, %v593_v4  ;;  %v3572_v1 = vadd.f32 %v3396_v60, %v590_v61 }
 0x234   : > { %v3451_v39 = vadd.f32 %v740_v29, %v602_v33  ;;  %v3489_v53 = vadd.f32 %v1063_v20, %v599_v51  ;;  %v3542_v20 = vadd.f32 %v3418_v8, %v595_v2  ;;  %v3561_v8 = vadd.f32 %v3400_v62, %v593_v4 }
 0x235   : > { %v2745_v22 = vpop.f32.mrf.mxu0  ;;  %v2708_v34 = vpop.f32.mrf.mxu1 }
 0x236   : > { %v3427_v24 = vadd.f32 %v2745_v22, %v604_v19  ;;  %v3442_v35 = vadd.f32 %v2708_v34, %v605_v25  ;;  %v3531_v19 = vadd.f32 %v3422_v11, %v595_v2  ;;  %v3550_v11 = vadd.f32 %v3392_v58, %v592_v6  ;;  %v591_v58 = vld [vmem:[%s4296_s7 + $0x8] sm:$0xff] }
 0x237   : > { %v1076_v26 = vpop.f32.mrf.mxu0  ;;  %v743_v42 = vpop.f32.mrf.mxu1  ;;  %v3564_v22 = vadd.f32 %v3402_v63, %v590_v61  ;;  %v3580_v62 = vadd.f32 %v3404_v0, %v591_v58 }
 0x238   : > { %1119 = vmax.xlane.f32.xlu0 %v3427_v24  ;;  %v3444_v36 = vadd.f32 %v1076_v26, %v602_v33  ;;  %v3462_v44 = vadd.f32 %v743_v42, %v603_v38 }
 0x239   : > { %v2746_v30 = vpop.f32.mrf.mxu0 }
 0x23a   : > { %v3435_v31 = vadd.f32 %v2746_v30, %v605_v25  ;;  %v3575_v25 = vadd.f32 %v3410_v3, %v591_v58 }
 0x23b   : > { %v1079_v37 = vpop.f32.mrf.mxu0 }
 0x23c   : > { %1121 = vmax.xlane.f32.xlu1 %v3435_v31  ;;  %783 = vmax.xlane.f32.xlu0 %v3432_v28  ;;  %v3453_v40 = vadd.f32 %v1079_v37, %v603_v38 }
 0x240   : > { %1115 = vmax.xlane.f32.xlu1 %v3444_v36  ;;  %785 = vmax.xlane.f32.xlu0 %v3442_v35 }
 0x244   : > { %1117 = vmax.xlane.f32.xlu0 %v3453_v40  ;;  %779 = vmax.xlane.f32.xlu1 %v3451_v39 }
 0x248   : > { %781 = vmax.xlane.f32.xlu0 %v3462_v44  ;;  %1111 = vmax.xlane.f32.xlu1 %v3460_v43 }
 0x24c   : > { %1113 = vmax.xlane.f32.xlu0 %v3471_v47  ;;  %775 = vmax.xlane.f32.xlu1 %v3469_v46 }
 0x250   : > { %777 = vmax.xlane.f32.xlu0 %v3478_v49  ;;  %1107 = vmax.xlane.f32.xlu1 %v3480_v50 }
 0x254   : > { %1109 = vmax.xlane.f32.xlu0 %v3489_v53  ;;  %771 = vmax.xlane.f32.xlu1 %v3487_v52 }
 0x258   : > { %773 = vmax.xlane.f32.xlu0 %v3498_v13  ;;  %1103 = vmax.xlane.f32.xlu1 %v3496_v10 }
 0x25c   : > { %1105 = vmax.xlane.f32.xlu0 %v3509_v15  ;;  %767 = vmax.xlane.f32.xlu1 %v3506_v12 }
 0x260   : > { %769 = vmax.xlane.f32.xlu0 %v3517_v16  ;;  %1099 = vmax.xlane.f32.xlu1 %v3520_v17 }
 0x264   : > { %1101 = vmax.xlane.f32.xlu0 %v3531_v19  ;;  %763 = vmax.xlane.f32.xlu1 %v3528_v9 }
 0x268   : > { %765 = vmax.xlane.f32.xlu0 %v3542_v20  ;;  %1095 = vmax.xlane.f32.xlu1 %v3539_v7 }
 0x26c   : > { %1097 = vmax.xlane.f32.xlu0 %v3553_v21  ;;  %759 = vmax.xlane.f32.xlu1 %v3550_v11 }
 0x270   : > { %761 = vmax.xlane.f32.xlu0 %v3561_v8  ;;  %1091 = vmax.xlane.f32.xlu1 %v3564_v22 }
 0x274   : > { %1093 = vmax.xlane.f32.xlu0 %v3575_v25  ;;  %755 = vmax.xlane.f32.xlu1 %v3572_v1 }
 0x278   : > { %757 = vmax.xlane.f32.xlu0 %v3580_v62 }
 0x2c1   : > { %v1120_v63 = vpop.xlane.xlu0 %1119 }
 0x2c2   : > { %v1137_v26 = vsub.f32 %v3427_v24, %v1120_v63 }
 0x2c4   : > { %v1167_v37 = vmul.f32 1.442695, %v1137_v26 }
 0x2c5   : > { %v784_v29 = vpop.xlane.xlu0 %783  ;;  %v1122_v30 = vpop.xlane.xlu1 %1121 }
 0x2c6   : > { %v801_v60 = vsub.f32 %v3432_v28, %v784_v29  ;;  %v1138_v33 = vsub.f32 %v3435_v31, %v1122_v30 }
 0x2c8   : > { %v831_v3 = vmul.f32 1.442695, %v801_v60  ;;  %v1169_v34 = vmul.f32 1.442695, %v1138_v33 }
 0x2c9   : > { %v786_v38 = vpop.xlane.xlu0 %785  ;;  %v1116_v41 = vpop.xlane.xlu1 %1115 }
 0x2ca   : > { %2919 = vpow2.f32 %v831_v3  ;;  %v802_v0 = vsub.f32 %v3442_v35, %v786_v38  ;;  %v1135_v42 = vsub.f32 %v3444_v36, %v1116_v41 }
 0x2cb   : > { %2921 = vpow2.f32 %v1169_v34 }
 0x2cc   : > { %v833_v45 = vmul.f32 1.442695, %v802_v0  ;;  %2923 = vpow2.f32 %v1167_v37  ;;  %v1163_v24 = vmul.f32 1.442695, %v1135_v42 }
 0x2cd   : > { %v1118_v48 = vpop.xlane.xlu0 %1117  ;;  %v780_v51 = vpop.xlane.xlu1 %779 }
 0x2ce   : > { %2925 = vpow2.f32 %v833_v45  ;;  %v1136_v28 = vsub.f32 %v3453_v40, %v1118_v48  ;;  %v799_v31 = vsub.f32 %v3451_v39, %v780_v51 }
 0x2cf   : > { %2927 = vpow2.f32 %v1163_v24 }
 0x2d0   : > { %v1165_v54 = vmul.f32 1.442695, %v1136_v28  ;;  %v827_v14 = vmul.f32 1.442695, %v799_v31 }
 0x2d1   : > { %v782_v5 = vpop.xlane.xlu0 %781  ;;  %v1112_v2 = vpop.xlane.xlu1 %1111 }
 0x2d2   : > { %2929 = vpow2.f32 %v1165_v54  ;;  %v800_v35 = vsub.f32 %v3462_v44, %v782_v5  ;;  %v1133_v36 = vsub.f32 %v3460_v43, %v1112_v2 }
 0x2d3   : > { %2931 = vpow2.f32 %v827_v14 }
 0x2d4   : > { %v829_v6 = vmul.f32 1.442695, %v800_v35  ;;  %v1159_v4 = vmul.f32 1.442695, %v1133_v36 }
 0x2d5   : > { %v1114_v61 = vpop.xlane.xlu0 %1113  ;;  %v776_v58 = vpop.xlane.xlu1 %775 }
 0x2d6   : > { %2933 = vpow2.f32 %v829_v6  ;;  %v1134_v40 = vsub.f32 %v3471_v47, %v1114_v61  ;;  %v797_v39 = vsub.f32 %v3469_v46, %v776_v58 }
 0x2d7   : > { %v3594_v63 = vpop.eup %2919  ;;  %2935 = vpow2.f32 %v1159_v4 }
 0x2d8   : > { %v3596_v26 = vpop.eup %2921  ;;  %v1161_v29 = vmul.f32 1.442695, %v1134_v40  ;;  %863 = vadd.xlane.f32.xlu1 %v3594_v63  ;;  %v823_v44 = vmul.f32 1.442695, %v797_v39 }
 0x2d9   : > { %1201 = vadd.xlane.f32.xlu0 %v3596_v26  ;;  %v778_v43 = vpop.xlane.xlu0 %777  ;;  %v1108_v30 = vpop.xlane.xlu1 %1107 }
 0x2da   : > { %v3600_v60 = vpop.eup %2923  ;;  %2937 = vpow2.f32 %v1161_v29  ;;  %v798_v47 = vsub.f32 %v3478_v49, %v778_v43  ;;  %v1131_v46 = vsub.f32 %v3480_v50, %v1108_v30 }
 0x2db   : > { %v3604_v33 = vpop.eup %2925  ;;  %2939 = vpow2.f32 %v823_v44 }
 0x2dc   : > { %v825_v3 = vmul.f32 1.442695, %v798_v47  ;;  %1199 = vadd.xlane.f32.xlu1 %v3600_v60  ;;  %v1155_v34 = vmul.f32 1.442695, %v1131_v46  ;;  %v3608_v41 = vpop.eup %2927 }
 0x2dd   : > { %865 = vadd.xlane.f32.xlu0 %v3604_v33  ;;  %v1110_v37 = vpop.xlane.xlu0 %1109  ;;  %v772_v38 = vpop.xlane.xlu1 %771 }
 0x2de   : > { %2941 = vpow2.f32 %v825_v3  ;;  %v1132_v0 = vsub.f32 %v3489_v53, %v1110_v37  ;;  %v795_v49 = vsub.f32 %v3487_v52, %v772_v38 }
 0x2df   : > { %v3612_v42 = vpop.eup %2929  ;;  %2943 = vpow2.f32 %v1155_v34 }
 0x2e0   : > { %v1157_v50 = vmul.f32 1.442695, %v1132_v0  ;;  %1195 = vadd.xlane.f32.xlu1 %v3608_v41  ;;  %v819_v45 = vmul.f32 1.442695, %v795_v49  ;;  %v3616_v51 = vpop.eup %2931 }
 0x2e1   : > { %1197 = vadd.xlane.f32.xlu0 %v3612_v42  ;;  %v774_v24 = vpop.xlane.xlu0 %773  ;;  %v1104_v48 = vpop.xlane.xlu1 %1103 }
 0x2e2   : > { %2945 = vpow2.f32 %v1157_v50  ;;  %v796_v28 = vsub.f32 %v3498_v13, %v774_v24  ;;  %v1129_v53 = vsub.f32 %v3496_v10, %v1104_v48 }
 0x2e3   : > { %v3620_v31 = vpop.eup %2933  ;;  %2947 = vpow2.f32 %v819_v45 }
 0x2e4   : > { %v821_v52 = vmul.f32 1.442695, %v796_v28  ;;  %859 = vadd.xlane.f32.xlu1 %v3616_v51  ;;  %v1151_v54 = vmul.f32 1.442695, %v1129_v53  ;;  %v3624_v2 = vpop.eup %2935 }
 0x2e5   : > { %861 = vadd.xlane.f32.xlu0 %v3620_v31  ;;  %v1106_v14 = vpop.xlane.xlu0 %1105  ;;  %v768_v5 = vpop.xlane.xlu1 %767 }
 0x2e6   : > { %2949 = vpow2.f32 %v821_v52  ;;  %v1130_v35 = vsub.f32 %v3509_v15, %v1106_v14  ;;  %v793_v13 = vsub.f32 %v3506_v12, %v768_v5  ;;  %v3222_v52 = vmov 0.0  }
 0x2e7   : > { %v3628_v36 = vpop.eup %2937  ;;  %2951 = vpow2.f32 %v1151_v54  ;;  %2709 = vmatprep.subr.bf16.mxu1 %v3222_v52  ;;  %2747 = vmatprep.subr.bf16.mxu0 %v3222_v52 }
 0x2e8   : > { %v1153_v10 = vmul.f32 1.442695, %v1130_v35  ;;  %1191 = vadd.xlane.f32.xlu1 %v3624_v2  ;;  %v815_v6 = vmul.f32 1.442695, %v793_v13  ;;  %v3632_v58 = vpop.eup %2939  ;;  %2725 = vmatprep.mubr.msk.bf16.mxu1 %vm3224_vm3, %v3222_v52 }
 0x2e9   : > { %1193 = vadd.xlane.f32.xlu0 %v3628_v36  ;;  %v770_v4 = vpop.xlane.xlu0 %769  ;;  %v1100_v61 = vpop.xlane.xlu1 %1099  ;;  %2763 = vmatprep.mubr.msk.bf16.mxu0 %vm3224_vm3, %v3222_v52 }
 0x2ea   : > { %2953 = vpow2.f32 %v1153_v10  ;;  %v794_v40 = vsub.f32 %v3517_v16, %v770_v4  ;;  %v1127_v15 = vsub.f32 %v3520_v17, %v1100_v61 }
 0x2eb   : > { %v3636_v39 = vpop.eup %2941  ;;  %2955 = vpow2.f32 %v815_v6 }
 0x2ec   : > { %v817_v12 = vmul.f32 1.442695, %v794_v40  ;;  %855 = vadd.xlane.f32.xlu1 %v3632_v58  ;;  %v1147_v29 = vmul.f32 1.442695, %v1127_v15  ;;  %v3640_v30 = vpop.eup %2943 }
 0x2ed   : > { %857 = vadd.xlane.f32.xlu0 %v3636_v39  ;;  %v1102_v44 = vpop.xlane.xlu0 %1101  ;;  %v764_v43 = vpop.xlane.xlu1 %763 }
 0x2ee   : > { %2957 = vpow2.f32 %v817_v12  ;;  %v1128_v47 = vsub.f32 %v3531_v19, %v1102_v44  ;;  %v791_v16 = vsub.f32 %v3528_v9, %v764_v43 }
 0x2ef   : > { %v3644_v46 = vpop.eup %2945  ;;  %2959 = vpow2.f32 %v1147_v29 }
 0x2f0   : > { %v1149_v17 = vmul.f32 1.442695, %v1128_v47  ;;  %1187 = vadd.xlane.f32.xlu1 %v3640_v30  ;;  %v811_v3 = vmul.f32 1.442695, %v791_v16  ;;  %v3648_v38 = vpop.eup %2947 }
 0x2f1   : > { %1189 = vadd.xlane.f32.xlu0 %v3644_v46  ;;  %v766_v34 = vpop.xlane.xlu0 %765  ;;  %v1096_v37 = vpop.xlane.xlu1 %1095 }
 0x2f2   : > { %2961 = vpow2.f32 %v1149_v17  ;;  %v792_v0 = vsub.f32 %v3542_v20, %v766_v34  ;;  %v1125_v19 = vsub.f32 %v3539_v7, %v1096_v37 }
 0x2f3   : > { %v3652_v49 = vpop.eup %2949  ;;  %2963 = vpow2.f32 %v811_v3 }
 0x2f4   : > { %v813_v9 = vmul.f32 1.442695, %v792_v0  ;;  %851 = vadd.xlane.f32.xlu1 %v3648_v38  ;;  %v1143_v50 = vmul.f32 1.442695, %v1125_v19  ;;  %v3656_v48 = vpop.eup %2951 }
 0x2f5   : > { %853 = vadd.xlane.f32.xlu0 %v3652_v49  ;;  %v1098_v45 = vpop.xlane.xlu0 %1097  ;;  %v760_v24 = vpop.xlane.xlu1 %759 }
 0x2f6   : > { %2965 = vpow2.f32 %v813_v9  ;;  %v1126_v28 = vsub.f32 %v3553_v21, %v1098_v45  ;;  %v789_v20 = vsub.f32 %v3550_v11, %v760_v24  ;;  %v385_v9 = vld [vmem:[%s4291_s2 + $0x48] sm:$0xff]  ;;  %v384_v45 = vld [vmem:[%s4291_s2 + $0x40] sm:$0xff]  ;;  %v379_v24 = vld [vmem:[%s4291_s2 + $0x18] sm:$0xff] }
 0x2f7   : > { %v3660_v53 = vpop.eup %2953  ;;  %2967 = vpow2.f32 %v1143_v50  ;;  %v378_v50 = vld [vmem:[%s4291_s2 + $0x10] sm:$0xff] }
 0x2f8   : > { %v1145_v7 = vmul.f32 1.442695, %v1126_v28  ;;  %1183 = vadd.xlane.f32.xlu1 %v3656_v48  ;;  %v807_v54 = vmul.f32 1.442695, %v789_v20  ;;  %v3666_v35 = vpop.eup %2955  ;;  %v3728_v28 = vld [vmem:[%s4292_s3] sm:$0xff]   ;;  %v3733_v20 = vld [vmem:[%s4292_s3 + $0x8] sm:$0xff]  }
 0x2f9   : > { %1185 = vadd.xlane.f32.xlu0 %v3660_v53  ;;  %v762_v14 = vpop.xlane.xlu0 %761  ;;  %v1092_v5 = vpop.xlane.xlu1 %1091 }
 0x2fa   : > { %2969 = vpow2.f32 %v1145_v7  ;;  %v790_v11 = vsub.f32 %v3561_v8, %v762_v14  ;;  %v1123_v21 = vsub.f32 %v3564_v22, %v1092_v5  ;;  %v382_v7 = vld [vmem:[%s4291_s2 + $0x30] sm:$0xff] }
 0x2fb   : > { %v3670_v13 = vpop.eup %2957  ;;  %2971 = vpow2.f32 %v807_v54  ;;  %v383_v54 = vld [vmem:[%s4291_s2 + $0x38] sm:$0xff] }
 0x2fc   : > { %v809_v10 = vmul.f32 1.442695, %v790_v11  ;;  %847 = vadd.xlane.f32.xlu1 %v3666_v35  ;;  %v1139_v6 = vmul.f32 1.442695, %v1123_v21  ;;  %v3674_v40 = vpop.eup %2959 }
 0x2fd   : > { %849 = vadd.xlane.f32.xlu0 %v3670_v13  ;;  %v1094_v4 = vpop.xlane.xlu0 %1093  ;;  %v756_v61 = vpop.xlane.xlu1 %755 }
 0x2fe   : > { %2973 = vpow2.f32 %v809_v10  ;;  %v1124_v15 = vsub.f32 %v3575_v25, %v1094_v4  ;;  %v787_v8 = vsub.f32 %v3572_v1, %v756_v61 }
 0x2ff   : > { %v3678_v12 = vpop.eup %2961  ;;  %2975 = vpow2.f32 %v1139_v6 }
 0x300   : > { %v1141_v22 = vmul.f32 1.442695, %v1124_v15  ;;  %1179 = vadd.xlane.f32.xlu1 %v3674_v40  ;;  %v803_v29 = vmul.f32 1.442695, %v787_v8  ;;  %v3682_v43 = vpop.eup %2963 }
 0x301   : > { %1181 = vadd.xlane.f32.xlu0 %v3678_v12  ;;  %v758_v44 = vpop.xlane.xlu0 %757 }
 0x302   : > { %2977 = vpow2.f32 %v1141_v22  ;;  %v788_v47 = vsub.f32 %v3580_v62, %v758_v44 }
 0x303   : > { %v3685_v16 = vpop.eup %2965  ;;  %2979 = vpow2.f32 %v803_v29 }
 0x304   : > { %v805_v25 = vmul.f32 1.442695, %v788_v47  ;;  %843 = vadd.xlane.f32.xlu1 %v3682_v43  ;;  %v3689_v1 = vpop.eup %2967 }
 0x305   : > { %845 = vadd.xlane.f32.xlu0 %v3685_v16 }
 0x306   : > { %2981 = vpow2.f32 %v805_v25 }
 0x307   : > { %v3691_v17 = vpop.eup %2969 }
 0x308   : > { %1175 = vadd.xlane.f32.xlu1 %v3689_v1  ;;  %v3695_v3 = vpop.eup %2971 }
 0x309   : > { %1177 = vadd.xlane.f32.xlu0 %v3691_v17 }
 0x30b   : > { %v3697_v62 = vpop.eup %2973 }
 0x30c   : > { %839 = vadd.xlane.f32.xlu1 %v3695_v3  ;;  %v3701_v34 = vpop.eup %2975 }
 0x30d   : > { %841 = vadd.xlane.f32.xlu0 %v3697_v62 }
 0x30f   : > { %v3703_v37 = vpop.eup %2977 }
 0x310   : > { %1171 = vadd.xlane.f32.xlu1 %v3701_v34  ;;  %v3707_v0 = vpop.eup %2979 }
 0x311   : > { %1173 = vadd.xlane.f32.xlu0 %v3703_v37 }
 0x313   : > { %v3709_v19 = vpop.eup %2981 }
 0x314   : > { %835 = vadd.xlane.f32.xlu1 %v3707_v0 }
 0x315   : > { %837 = vadd.xlane.f32.xlu0 %v3709_v19 }
 0x325   : > { %435 = vperm.xlu1 %2906, %v385_v9  }
 0x329   : > { %400 = vperm.xlu1 %2906, %v378_v50  }
 0x32b   : > { %430 = vperm.xlu0 %2905, %v384_v45  }
 0x32d   : > { %405 = vperm.xlu1 %2906, %v379_v24  }
 0x32f   : > { %1294 = vrot.lane.b32.xlu0 %v3728_v28, %s3223_s16 }
 0x331   : > { %1296 = vrot.lane.b32.xlu1 %v3733_v20, %s3223_s16 }
 0x333   : > { %420 = vperm.xlu0 %2905, %v382_v7  }
 0x335   : > { %425 = vperm.xlu1 %2906, %v383_v54  }
 0x361   : > { %v864_v14 = vpop.xlane.xlu1 %863 }
 0x362   : > { %v1202_v5 = vpop.xlane.xlu0 %1201 }
 0x363   : > { %2983 = vrcp.f32 %v1202_v5 }
 0x364   : > { %2985 = vrcp.f32 %v864_v14 }
 0x365   : > { %v1200_v11 = vpop.xlane.xlu1 %1199 }
 0x366   : > { %v866_v21 = vpop.xlane.xlu0 %865  ;;  %2987 = vrcp.f32 %v1200_v11 }
 0x367   : > { %2989 = vrcp.f32 %v866_v21 }
 0x369   : > { %v1196_v10 = vpop.xlane.xlu1 %1195 }
 0x36a   : > { %v1198_v6 = vpop.xlane.xlu0 %1197  ;;  %2991 = vrcp.f32 %v1196_v10 }
 0x36b   : > { %2993 = vrcp.f32 %v1198_v6 }
 0x36d   : > { %v860_v4 = vpop.xlane.xlu1 %859 }
 0x36e   : > { %v862_v61 = vpop.xlane.xlu0 %861  ;;  %2995 = vrcp.f32 %v860_v4 }
 0x36f   : > { %2997 = vrcp.f32 %v862_v61 }
 0x370   : > { %v2984_v15 = vpop.eup %2983 }
 0x371   : > { %v1192_v8 = vpop.xlane.xlu1 %1191  ;;  %v2986_v22 = vpop.eup %2985  ;;  %v1234_v9 = vmul.f32 %v2984_v15, %v3596_v26 }
 0x372   : > { %v1194_v29 = vpop.xlane.xlu0 %1193  ;;  %2999 = vrcp.f32 %v1192_v8  ;;  %v897_v45 = vmul.f32 %v2986_v22, %v3594_v63 }
 0x373   : > { %v2988_v44 = vpop.eup %2987  ;;  %3001 = vrcp.f32 %v1194_v29 }
 0x374   : > { %v2990_v47 = vpop.eup %2989  ;;  %v1233_v25 = vmul.f32 %v2988_v44, %v3600_v60 }
 0x375   : > { %v856_v50 = vpop.xlane.xlu1 %855  ;;  %v898_v24 = vmul.f32 %v2990_v47, %v3604_v33 }
 0x376   : > { %v858_v7 = vpop.xlane.xlu0 %857  ;;  %3003 = vrcp.f32 %v856_v50  ;;  %v1242_v54 = vpack.c.bf16 %v1234_v9, %v1233_v25 }
 0x377   : > { %v2992_v14 = vpop.eup %2991  ;;  %3005 = vrcp.f32 %v858_v7  ;;  %v906_v5 = vpack.c.bf16 %v898_v24, %v897_v45 }
 0x378   : > { %v2994_v11 = vpop.eup %2993  ;;  %2748 = vmatpush3.bf16.xpose.msra.mxu0 %v1242_v54  ;;  %v1231_v63 = vmul.f32 %v2992_v14, %v3608_v41 }
 0x379   : > { %2710 = vmatpush3.bf16.xpose.msra.mxu1 %v906_v5  ;;  %v1188_v21 = vpop.xlane.xlu1 %1187  ;;  %2749 = vmatprep.subr.bf16.mxu0 %v3222_v52  ;;  %v1232_v26 = vmul.f32 %v2994_v11, %v3612_v42 }
 0x37a   : > { %v1190_v60 = vpop.xlane.xlu0 %1189  ;;  %3007 = vrcp.f32 %v1188_v21  ;;  %2711 = vmatprep.subr.bf16.mxu1 %v3222_v52 }
 0x37b   : > { %v2996_v33 = vpop.eup %2995  ;;  %3009 = vrcp.f32 %v1190_v60  ;;  %v1241_v8 = vpack.c.bf16 %v1232_v26, %v1231_v63 }
 0x37c   : > { %v2998_v10 = vpop.eup %2997  ;;  %v895_v6 = vmul.f32 %v2996_v33, %v3616_v51 }
 0x37d   : > { %v852_v4 = vpop.xlane.xlu1 %851  ;;  %v896_v61 = vmul.f32 %v2998_v10, %v3620_v31 }
 0x37e   : > { %v854_v15 = vpop.xlane.xlu0 %853  ;;  %3011 = vrcp.f32 %v852_v4 }
 0x37f   : > { %v3000_v22 = vpop.eup %2999  ;;  %3013 = vrcp.f32 %v854_v15  ;;  %v905_v29 = vpack.c.bf16 %v896_v61, %v895_v6 }
 0x380   : > { %v3002_v44 = vpop.eup %3001  ;;  %2750 = vmatpush3.bf16.xpose.msra.mxu0 %v1241_v8  ;;  %v1229_v51 = vmul.f32 %v3000_v22, %v3624_v2 }
 0x381   : > { %2712 = vmatpush3.bf16.xpose.msra.mxu1 %v905_v29  ;;  %v1184_v41 = vpop.xlane.xlu1 %1183  ;;  %2751 = vmatprep.subr.bf16.mxu0 %v3222_v52  ;;  %v1230_v31 = vmul.f32 %v3002_v44, %v3628_v36 }
 0x382   : > { %v1186_v42 = vpop.xlane.xlu0 %1185  ;;  %3015 = vrcp.f32 %v1184_v41  ;;  %2713 = vmatprep.subr.bf16.mxu1 %v3222_v52 }
 0x383   : > { %v3004_v47 = vpop.eup %3003  ;;  %3017 = vrcp.f32 %v1186_v42  ;;  %v1240_v7 = vpack.c.bf16 %v1230_v31, %v1229_v51 }
 0x384   : > { %v3006_v25 = vpop.eup %3005  ;;  %v893_v9 = vmul.f32 %v3004_v47, %v3632_v58 }
 0x385   : > { %v848_v50 = vpop.xlane.xlu1 %847  ;;  %v894_v45 = vmul.f32 %v3006_v25, %v3636_v39 }
 0x386   : > { %v850_v24 = vpop.xlane.xlu0 %849  ;;  %3019 = vrcp.f32 %v848_v50 }
 0x387   : > { %v3008_v54 = vpop.eup %3007  ;;  %3021 = vrcp.f32 %v850_v24  ;;  %v904_v14 = vpack.c.bf16 %v894_v45, %v893_v9 }
 0x388   : > { %v3010_v5 = vpop.eup %3009  ;;  %2752 = vmatpush3.bf16.xpose.msra.mxu0 %v1240_v7  ;;  %v1227_v58 = vmul.f32 %v3008_v54, %v3640_v30 }
 0x389   : > { %2714 = vmatpush3.bf16.xpose.msra.mxu1 %v904_v14  ;;  %v1180_v2 = vpop.xlane.xlu1 %1179  ;;  %2753 = vmatprep.subr.bf16.mxu0 %v3222_v52  ;;  %v1228_v39 = vmul.f32 %v3010_v5, %v3644_v46 }
 0x38a   : > { %v1182_v36 = vpop.xlane.xlu0 %1181  ;;  %3023 = vrcp.f32 %v1180_v2  ;;  %2715 = vmatprep.subr.bf16.mxu1 %v3222_v52 }
 0x38b   : > { %v3012_v11 = vpop.eup %3011  ;;  %3025 = vrcp.f32 %v1182_v36  ;;  %v1239_v10 = vpack.c.bf16 %v1228_v39, %v1227_v58 }
 0x38c   : > { %v3014_v21 = vpop.eup %3013  ;;  %v891_v60 = vmul.f32 %v3012_v11, %v3648_v38 }
 0x38d   : > { %v844_v63 = vpop.xlane.xlu1 %843  ;;  %v892_v26 = vmul.f32 %v3014_v21, %v3652_v49 }
 0x38e   : > { %v846_v33 = vpop.xlane.xlu0 %845  ;;  %3027 = vrcp.f32 %v844_v63 }
 0x38f   : > { %v3016_v6 = vpop.eup %3015  ;;  %3029 = vrcp.f32 %v846_v33  ;;  %v903_v4 = vpack.c.bf16 %v892_v26, %v891_v60 }
 0x390   : > { %v3018_v61 = vpop.eup %3017  ;;  %2754 = vmatpush3.bf16.xpose.msra.mxu0 %v1239_v10  ;;  %v1225_v38 = vmul.f32 %v3016_v6, %v3656_v48 }
 0x391   : > { %2716 = vmatpush3.bf16.xpose.msra.mxu1 %v903_v4  ;;  %v1176_v30 = vpop.xlane.xlu1 %1175  ;;  %2755 = vmatprep.subr.bf16.mxu0 %v3222_v52  ;;  %v1226_v49 = vmul.f32 %v3018_v61, %v3660_v53 }
 0x392   : > { %v1178_v46 = vpop.xlane.xlu0 %1177  ;;  %3031 = vrcp.f32 %v1176_v30  ;;  %2717 = vmatprep.subr.bf16.mxu1 %v3222_v52 }
 0x393   : > { %v3020_v15 = vpop.eup %3019  ;;  %3033 = vrcp.f32 %v1178_v46  ;;  %v1238_v42 = vpack.c.bf16 %v1226_v49, %v1225_v38 }
 0x394   : > { %v3022_v8 = vpop.eup %3021  ;;  %v889_v22 = vmul.f32 %v3020_v15, %v3666_v35 }
 0x395   : > { %v840_v29 = vpop.xlane.xlu1 %839  ;;  %v890_v44 = vmul.f32 %v3022_v8, %v3670_v13 }
 0x396   : > { %v842_v41 = vpop.xlane.xlu0 %841  ;;  %3035 = vrcp.f32 %v840_v29 }
 0x397   : > { %v3024_v51 = vpop.eup %3023  ;;  %3037 = vrcp.f32 %v842_v41  ;;  %v902_v31 = vpack.c.bf16 %v890_v44, %v889_v22 }
 0x398   : > { %v3026_v47 = vpop.eup %3025  ;;  %2756 = vmatpush3.bf16.xpose.msra.mxu0 %v1238_v42  ;;  %v1223_v35 = vmul.f32 %v3024_v51, %v3674_v40 }
 0x399   : > { %2718 = vmatpush3.bf16.xpose.msra.mxu1 %v902_v31  ;;  %v1172_v48 = vpop.xlane.xlu1 %1171  ;;  %2757 = vmatprep.subr.bf16.mxu0 %v3222_v52  ;;  %v1224_v13 = vmul.f32 %v3026_v47, %v3678_v12 }
 0x39a   : > { %v1174_v53 = vpop.xlane.xlu0 %1173  ;;  %3039 = vrcp.f32 %v1172_v48  ;;  %2719 = vmatprep.subr.bf16.mxu1 %v3222_v52 }
 0x39b   : > { %v3028_v25 = vpop.eup %3027  ;;  %3041 = vrcp.f32 %v1174_v53  ;;  %v1237_v54 = vpack.c.bf16 %v1224_v13, %v1223_v35 }
 0x39c   : > { %v3030_v9 = vpop.eup %3029  ;;  %v887_v50 = vmul.f32 %v3028_v25, %v3682_v43 }
 0x39d   : > { %v836_v45 = vpop.xlane.xlu1 %835  ;;  %v888_v24 = vmul.f32 %v3030_v9, %v3685_v16 }
 0x39e   : > { %v838_v7 = vpop.xlane.xlu0 %837  ;;  %3043 = vrcp.f32 %v836_v45 }
 0x39f   : > { %v3032_v14 = vpop.eup %3031  ;;  %3045 = vrcp.f32 %v838_v7  ;;  %v901_v5 = vpack.c.bf16 %v888_v24, %v887_v50 }
 0x3a0   : > { %v3034_v2 = vpop.eup %3033  ;;  %2758 = vmatpush3.bf16.xpose.msra.mxu0 %v1237_v54  ;;  %v1221_v12 = vmul.f32 %v3032_v14, %v3689_v1 }
 0x3a1   : > { %2720 = vmatpush3.bf16.xpose.msra.mxu1 %v901_v5  ;;  %v436_v40 = vpop.permute.xlu1 %435  ;;  %2759 = vmatprep.subr.bf16.mxu0 %v3222_v52  ;;  %v1222_v43 = vmul.f32 %v3034_v2, %v3691_v17 }
 0x3a2   : > { %2721 = vmatprep.subr.bf16.mxu1 %v3222_v52 }
 0x3a3   : > { %v3036_v36 = vpop.eup %3035  ;;  %v1236_v60 = vpack.c.bf16 %v1222_v43, %v1221_v12 }
 0x3a4   : > { %v3038_v16 = vpop.eup %3037  ;;  %v885_v58 = vmul.f32 %v3036_v36, %v3695_v3 }
 0x3a5   : > { %v401_v39 = vpop.permute.xlu1 %400  ;;  %v886_v11 = vmul.f32 %v3038_v16, %v3697_v62 }
 0x3a6   : > { %v552_v21 = vadd.f32 %v3358_v18, %v401_v39  ;;  %v431_v49 = vpop.permute.xlu0 %430 }
 0x3a7   : > { %v3040_v63 = vpop.eup %3039  ;;  %v900_v26 = vpack.c.bf16 %v886_v11, %v885_v58 }
 0x3a8   : > { %v3042_v33 = vpop.eup %3041  ;;  %v1414_v10 = vpack.c.bf16 %v552_v21, %v552_v21  ;;  %2760 = vmatpush3.bf16.xpose.msra.mxu0 %v1236_v60  ;;  %v1219_v17 = vmul.f32 %v3040_v63, %v3701_v34  ;;  %v576_v34 = vadd.f32 %v3388_v56, %v431_v49 }
 0x3a9   : > { %2722 = vmatpush3.bf16.xpose.msra.mxu1 %v900_v26  ;;  %v406_v6 = vpop.permute.xlu1 %405  ;;  %2761 = vmatprep.subr.bf16.mxu0 %v3222_v52  ;;  %v1220_v3 = vmul.f32 %v3042_v33, %v3703_v37 }
 0x3aa   : > { %v555_v1 = vadd.f32 %v3360_v23, %v406_v6  ;;  %1417 = vxpose.xlu0.c.b16.start.end [1/1] (short) %v1414_v10, 128  ;;  %2723 = vmatprep.subr.bf16.mxu1 %v3222_v52  ;;  %v579_v23 = vadd.f32 %v3394_v59, %v436_v40  ;;  %v612_v44 = vpack.c.bf16 %v576_v34, %v576_v34 }
 0x3ab   : > { %v3044_v18 = vpop.eup %3043  ;;  %v1235_v38 = vpack.c.bf16 %v1220_v3, %v1219_v17 }
 0x3ac   : > { %v3046_v62 = vpop.eup %3045  ;;  %v1816_v4 = vpack.c.bf16 %v555_v1, %v555_v1  ;;  %v883_v61 = vmul.f32 %v3044_v18, %v3707_v0  ;;  %v950_v29 = vpack.c.bf16 %v579_v23, %v579_v23 }
 0x3ad   : > { %v1297_v30 = vpop.permute.xlu1 %1296  ;;  %v884_v46 = vmul.f32 %v3046_v62, %v3709_v19  ;;  %v1295_v19 = vpop.permute.xlu0 %1294 }
 0x3ae   : > { %1819 = vxpose.xlu1.c.b16.start.end [1/1] (short) %v1816_v4, 128 }
 0x3af   : > { %v899_v15 = vpack.c.bf16 %v884_v46, %v883_v61 }
 0x3b0   : > { %2762 = vmatpush3.bf16.xpose.msra.mxu0 %v1235_v38 }
 0x3b1   : > { %2724 = vmatpush3.bf16.xpose.msra.mxu1 %v899_v15  ;;  %v426_v8 = vpop.permute.xlu1 %425  ;;  %v421_v48 = vpop.permute.xlu0 %420 }
 0x3b2   : > { %v571_v37 = vadd.f32 %v3364_v32, %v426_v8  ;;  %v568_v50 = vadd.f32 %v3362_v27, %v421_v48 }
 0x3b4   : > { %v1817_v22 = vpack.c.bf16 %v571_v37, %v571_v37  ;;  %v1415_v2 = vpack.c.bf16 %v568_v50, %v568_v50  ;;  %v3178_v50 = vld [vmem:[%s4296_s7 + $0x60] sm:$0xff] }
 0x3b6   : > { %2873 = vmatprep.subr.msk.bf16.mxu0 %vm654_vm1, %v1817_v22  ;;  %v1860_v0 = vsel %vm654_vm1, %v1817_v22, 0  ;;  %v1458_v36 = vsel %vm654_vm1, %v1415_v2, 0 }
 0x3b7   : > { %2764 = vmatmul.mubr.bf16.vlgmr.msra.gmra.mxu0 %v950_v29 }
 0x3b8   : > { %2726 = vmatmul.mubr.bf16.vlgmr.msra.gmra.mxu1 %v612_v44  ;;  %2824 = vmatpush3.bf16.msra.mxu0 %v1860_v0 }
 0x3b9   : > { %2769 = vmatprep.mubr.msk.bf16.mxu1 %vm629_vm2, %v1295_v19  ;;  %2841 = vmatprep.subr.bf16.mxu0 %v3222_v52 }
 0x40c   : > { %v1425_v25 = vpop.trf.xlu0 }
 0x410   : > { %v1827_v59 = vpop.trf.xlu1  ;;  %v1426_v43 = vpop.trf.xlu0 }
 0x411   : > { %2825 = vmatprep.mubr.msk.bf16.mxu0 %vm629_vm2, %v1827_v59 }
 0x414   : > { %v1828_v56 = vpop.trf.xlu1  ;;  %v1427_v27 = vpop.trf.xlu0 }
 0x415   : > { %2826 = vmatmul.mubr.msk.bf16.vlgmr.msra.gmra.mxu0 %vm629_vm2, %v1828_v56 }
 0x418   : > { %v1829_v32 = vpop.trf.xlu1  ;;  %v1428_v16 = vpop.trf.xlu0 }
 0x419   : > { %2829 = vmatprep.mubr.msk.bf16.mxu0 %vm629_vm2, %v1829_v32 }
 0x41c   : > { %v1830_v41 = vpop.trf.xlu1  ;;  %v1429_v58 = vpop.trf.xlu0 }
 0x41d   : > { %2830 = vmatmul.mubr.msk.bf16.gmra.mxu0 %vm629_vm2, %v1830_v41 }
 0x420   : > { %v1831_v42 = vpop.trf.xlu1 }
 0x421   : > { %2833 = vmatprep.mubr.msk.bf16.mxu0 %vm629_vm2, %v1831_v42 }
 0x424   : > { %v1832_v51 = vpop.trf.xlu1 }
 0x425   : > { %2834 = vmatmul.mubr.msk.bf16.gmra.mxu0 %vm629_vm2, %v1832_v51 }
 0x428   : > { %v1833_v31 = vpop.trf.xlu1 }
 0x429   : > { %2837 = vmatprep.mubr.msk.bf16.mxu0 %vm629_vm2, %v1833_v31 }
 0x42c   : > { %v1834_v47 = vpop.trf.xlu1 }
 0x42d   : > { %2838 = vmatmul.mubr.msk.bf16.gmra.mxu0 %vm629_vm2, %v1834_v47 }
 0x42e   : > { %2857 = vmatprep.mubr.msk.bf16.mxu0 %vm3224_vm3, %v3222_v52 }
 0x477   : > { %v1277_v53 = vpop.f32.mrf.mxu0 }
 0x478   : > { %v941_v35 = vpop.f32.mrf.mxu1  ;;  %v1283_v13 = vpack.c.bf16 %v1277_v53, %v1277_v53  ;;  %v3177_v53 = vld [vmem:[%s4296_s7 + $0x70] sm:$0xff] }
 0x479   : > { %v2765_v9 = vpop.f32.mrf.mxu0  ;;  %v947_v45 = vpack.c.bf16 %v941_v35, %v941_v35 }
 0x47a   : > { %v1305_v24 = vsel %vm654_vm1, %v1283_v13, 0  ;;  %v2727_v7 = vpop.f32.mrf.mxu1  ;;  %2869 = vmatprep.subr.msk.bf16.mxu1 %vm654_vm1, %v1283_v13 }
 0x47b   : > { %v1280_v54 = vpop.f32.mrf.mxu0  ;;  %2768 = vmatpush3.bf16.msra.mxu1 %v1305_v24  ;;  %v1363_v40 = vsel %vm654_vm1, %v947_v45, 0  ;;  %v3179_v24 = vld [vmem:[%s4296_s7 + $0x78] sm:$0xff] }
 0x47c   : > { %v944_v14 = vpop.f32.mrf.mxu1  ;;  %2870 = vmatprep.subr.msk.bf16.mxu1 %vm654_vm1, %v947_v45 }
 0x47d   : > { %v2766_v5 = vpop.f32.mrf.mxu0 }
 0x47e   : > { %v2728_v12 = vpop.f32.mrf.mxu1  ;;  %2770 = vmatmul.mubr.msk.bf16.vlgmr.msra.gmra.mxu1 %vm629_vm2, %v1297_v30 }
 0x47f   : > { %2774 = vmatpush3.bf16.msra.mxu1 %v1363_v40  ;;  %2775 = vmatprep.mubr.msk.bf16.mxu1 %vm629_vm2, %v3728_v28  ;;  %v1430_v28 = vpop.trf.xlu0  ;;  %v3180_v40 = vld [vmem:[%s4296_s7 + $0x50] sm:$0xff] }
 0x480   : > { %2871 = vmatprep.subr.msk.bf16.mxu1 %vm654_vm1, %v1415_v2 }
 0x483   : > { %v1431_v39 = vpop.trf.xlu0 }
 0x486   : > { %2776 = vmatmul.mubr.msk.bf16.vlgmr.msra.gmra.mxu1 %vm629_vm2, %v3733_v20 }
 0x487   : > { %2780 = vmatpush3.bf16.msra.mxu1 %v1458_v36  ;;  %2781 = vmatprep.mubr.msk.bf16.mxu1 %vm629_vm2, %v1425_v25  ;;  %v1432_v20 = vpop.trf.xlu0  ;;  %v3182_v36 = vld [vmem:[%s4296_s7 + $0x58] sm:$0xff] }
 0x488   : > { %2797 = vmatprep.subr.bf16.mxu1 %v3222_v52 }
 0x48e   : > { %2782 = vmatmul.mubr.msk.bf16.vlgmr.msra.gmra.mxu1 %vm629_vm2, %v1426_v43  ;;  %v3181_v43 = vld [vmem:[%s4296_s7 + $0x68] sm:$0xff] }
 0x48f   : > { %2785 = vmatprep.mubr.msk.bf16.mxu1 %vm629_vm2, %v1427_v27 }
 0x496   : > { %2786 = vmatmul.mubr.msk.bf16.gmra.mxu1 %vm629_vm2, %v1428_v16 }
 0x497   : > { %2789 = vmatprep.mubr.msk.bf16.mxu1 %vm629_vm2, %v1429_v58 }
 0x49e   : > { %2790 = vmatmul.mubr.msk.bf16.gmra.mxu1 %vm629_vm2, %v1430_v28 }
 0x49f   : > { %2793 = vmatprep.mubr.msk.bf16.mxu1 %vm629_vm2, %v1431_v39  ;;  %v3183_v39 = vld [vmem:[%s4296_s7 + $0x40] sm:$0xff] }
 0x4a6   : > { %2794 = vmatmul.mubr.msk.bf16.gmra.mxu1 %vm629_vm2, %v1432_v20 }
 0x4a7   : > { %2813 = vmatprep.mubr.msk.bf16.mxu1 %vm3224_vm3, %v3222_v52 }
 0x4d5   : > { %v3835_v11 = vpop.f32.mrf.mxu0 }
 0x4d7   : > { %v3837_v21 = vpop.f32.mrf.mxu0 }
 0x4d9   : > { %v3839_v60 = vpop.f32.mrf.mxu0 }
 0x4db   : > { %v3841_v33 = vpop.f32.mrf.mxu0 }
 0x4dd   : > { %v3843_v1 = vpop.f32.mrf.mxu0 }
 0x4df   : > { %v3847_v62 = vpop.f32.mrf.mxu0 }
 0x4e1   : > { %v3853_v38 = vpop.f32.mrf.mxu0 }
 0x4e3   : > { %v3861_v8 = vpop.f32.mrf.mxu0 }
 0x4e5   : > { %v2835_v22 = vpop.f32.mrf.mxu0 }
 0x4e7   : > { %v1928_v0 = vpop.f32.mrf.mxu0 }
 0x4e9   : > { %v2836_v56 = vpop.f32.mrf.mxu0 }
 0x4eb   : > { %v1931_v42 = vpop.f32.mrf.mxu0 }
 0x4ed   : > { %v2839_v47 = vpop.f32.mrf.mxu0 }
 0x4ee   : > { %v3887_v14 = vadd.f32 %v3177_v53, %v2839_v47 }
 0x4ef   : > { %v1944_v25 = vpop.f32.mrf.mxu0 }
 0x4f0   : > { %v3912_v58 = vadd.f32 %v3178_v50, %v1944_v25 }
 0x4f1   : > { %v2840_v54 = vpop.f32.mrf.mxu0 }
 0x4f2   : > { %v3889_v5 = vadd.f32 %v3179_v24, %v2840_v54 }
 0x4f3   : > { %v1947_v28 = vpop.f32.mrf.mxu0 }
 0x53e   : > { %v2771_v63 = vpop.f32.mrf.mxu1 }
 0x540   : > { %v1341_v26 = vpop.f32.mrf.mxu1 }
 0x542   : > { %v2772_v10 = vpop.f32.mrf.mxu1 }
 0x544   : > { %v1344_v6 = vpop.f32.mrf.mxu1 }
 0x546   : > { %v2777_v17 = vpop.f32.mrf.mxu1 }
 0x547   : > { %v3845_v3 = vadd.f32 %v2777_v17, %v2771_v63  ;;  %v3921_v63 = vadd.f32 %v3181_v43, %v1947_v28  ;;  %v3185_v17 = vld [vmem:[%s4296_s7 + $0x30] sm:$0xff] }
 0x548   : > { %v1399_v18 = vpop.f32.mrf.mxu1 }
 0x549   : > { %v3849_v4 = vadd.f32 %v1399_v18, %v1341_v26  ;;  %v3925_v26 = vadd.f32 %v3180_v40, %v2835_v22 }
 0x54a   : > { %v2778_v61 = vpop.f32.mrf.mxu1 }
 0x54b   : > { %v3851_v30 = vadd.f32 %v2778_v61, %v2772_v10  ;;  %v3184_v10 = vld [vmem:[%s4296_s7 + $0x48] sm:$0xff]  ;;  %v3939_v61 = vadd.f32 %v3182_v36, %v2836_v56 }
 0x54c   : > { %v1402_v46 = vpop.f32.mrf.mxu1 }
 0x54d   : > { %v3855_v49 = vadd.f32 %v1402_v46, %v1344_v6  ;;  %v3186_v46 = vld [vmem:[%s4296_s7 + $0x38] sm:$0xff] }
 0x54e   : > { %v3857_v15 = vpop.f32.mrf.mxu1 }
 0x550   : > { %v3859_v23 = vpop.f32.mrf.mxu1 }
 0x552   : > { %v3863_v34 = vpop.f32.mrf.mxu1 }
 0x554   : > { %v3865_v37 = vpop.f32.mrf.mxu1 }
 0x556   : > { %v2787_v29 = vpop.f32.mrf.mxu1 }
 0x557   : > { %v3937_v18 = vadd.f32 %v3185_v17, %v2787_v29  ;;  %v3187_v29 = vld [vmem:[%s4296_s7 + $0x20] sm:$0xff] }
 0x558   : > { %v3867_v44 = vpop.f32.mrf.mxu1  ;;  %v3991_v47 = vadd.f32 %v3187_v29, %v3847_v62 }
 0x559   : > { %v3956_v56 = vadd.f32 %v3187_v29, %v3867_v44  ;;  %v3189_v44 = vld [vmem:[%s4296_s7 + $0x10] sm:$0xff] }
 0x55a   : > { %v2788_v19 = vpop.f32.mrf.mxu1  ;;  %v4007_v62 = vadd.f32 %v3189_v44, %v3835_v11 }
 0x55b   : > { %v3946_v22 = vadd.f32 %v3186_v46, %v2788_v19  ;;  %v3188_v19 = vld [vmem:[%s4296_s7 + $0x28] sm:$0xff] }
 0x55c   : > { %v3869_v59 = vpop.f32.mrf.mxu1 }
 0x55e   : > { %v2791_v32 = vpop.f32.mrf.mxu1 }
 0x55f   : > { %v3898_v12 = vadd.f32 %v3180_v40, %v2791_v32  ;;  %v3948_v32 = vadd.f32 %v3183_v39, %v1928_v0  ;;  %v3963_v0 = vadd.f32 %v3185_v17, %v3843_v1  ;;  %v3980_v1 = vadd.f32 %v3186_v46, %v3853_v38  ;;  %v3191_v38 = vld [vmem:[%s4296_s7] sm:$0xff] }
 0x560   : > { %v1526_v41 = vpop.f32.mrf.mxu1 }
 0x561   : > { %v3919_v20 = vadd.f32 %v3183_v39, %v1526_v41  ;;  %v3958_v41 = vadd.f32 %v3184_v10, %v1931_v42  ;;  %v3977_v42 = vadd.f32 %v3189_v44, %v3857_v15  ;;  %v3999_v15 = vadd.f32 %v3191_v38, %v3859_v23 }
 0x562   : > { %v2792_v51 = vpop.f32.mrf.mxu1  ;;  %v4018_v23 = vadd.f32 %v3191_v38, %v3837_v21 }
 0x563   : > { %v3910_v16 = vadd.f32 %v3182_v36, %v2792_v51  ;;  %v3969_v51 = vadd.f32 %v3188_v19, %v3869_v59  ;;  %v3190_v59 = vld [vmem:[%s4296_s7 + $0x18] sm:$0xff] }
 0x564   : > { %v1529_v31 = vpop.f32.mrf.mxu1 }
 0x565   : > { %v3930_v6 = vadd.f32 %v3184_v10, %v1529_v31  ;;  %v3988_v31 = vadd.f32 %v3190_v59, %v3863_v34  ;;  %v3192_v34 = vld [vmem:[%s4296_s7 + $0x8] sm:$0xff] }
 0x566   : > { %v2795_v48 = vpop.f32.mrf.mxu1  ;;  %v4026_v11 = vadd.f32 %v3192_v34, %v3841_v33 }
 0x567   : > { %v3874_v35 = vadd.f32 %v3177_v53, %v2795_v48  ;;  %v4002_v48 = vadd.f32 %v3188_v19, %v3861_v8  ;;  %v4013_v53 = vadd.f32 %v3192_v34, %v3865_v37  ;;  %v4021_v8 = vadd.f32 %v3190_v59, %v3839_v60 }
 0x568   : > { %v1542_v13 = vpop.f32.mrf.mxu1 }
 0x569   : > { %1585 = vmax.xlane.f32.xlu0 %v3874_v35  ;;  %v3880_v45 = vadd.f32 %v3178_v50, %v1542_v13 }
 0x56a   : > { %v2796_v9 = vpop.f32.mrf.mxu1 }
 0x56b   : > { %v3885_v7 = vadd.f32 %v3179_v24, %v2796_v9 }
 0x56c   : > { %v1545_v2 = vpop.f32.mrf.mxu1 }
 0x56d   : > { %1587 = vmax.xlane.f32.xlu1 %v3885_v7  ;;  %1581 = vmax.xlane.f32.xlu0 %v3880_v45  ;;  %v3903_v27 = vadd.f32 %v3181_v43, %v1545_v2 }
 0x571   : > { %1987 = vmax.xlane.f32.xlu1 %v3887_v14  ;;  %1989 = vmax.xlane.f32.xlu0 %v3889_v5 }
 0x575   : > { %1577 = vmax.xlane.f32.xlu1 %v3898_v12  ;;  %1583 = vmax.xlane.f32.xlu0 %v3903_v27 }
 0x579   : > { %1579 = vmax.xlane.f32.xlu0 %v3910_v16  ;;  %1983 = vmax.xlane.f32.xlu1 %v3912_v58 }
 0x57d   : > { %1985 = vmax.xlane.f32.xlu0 %v3921_v63  ;;  %1573 = vmax.xlane.f32.xlu1 %v3919_v20 }
 0x581   : > { %1575 = vmax.xlane.f32.xlu0 %v3930_v6  ;;  %1979 = vmax.xlane.f32.xlu1 %v3925_v26 }
 0x585   : > { %1981 = vmax.xlane.f32.xlu0 %v3939_v61  ;;  %1569 = vmax.xlane.f32.xlu1 %v3937_v18 }
 0x589   : > { %1571 = vmax.xlane.f32.xlu0 %v3946_v22  ;;  %1975 = vmax.xlane.f32.xlu1 %v3948_v32 }
 0x58d   : > { %1977 = vmax.xlane.f32.xlu0 %v3958_v41  ;;  %1565 = vmax.xlane.f32.xlu1 %v3956_v56 }
 0x591   : > { %1567 = vmax.xlane.f32.xlu0 %v3969_v51  ;;  %1971 = vmax.xlane.f32.xlu1 %v3963_v0 }
 0x595   : > { %1973 = vmax.xlane.f32.xlu0 %v3980_v1  ;;  %1561 = vmax.xlane.f32.xlu1 %v3977_v42 }
 0x599   : > { %1563 = vmax.xlane.f32.xlu0 %v3988_v31  ;;  %1967 = vmax.xlane.f32.xlu1 %v3991_v47 }
 0x59d   : > { %1969 = vmax.xlane.f32.xlu0 %v4002_v48  ;;  %1557 = vmax.xlane.f32.xlu1 %v3999_v15 }
 0x5a1   : > { %1559 = vmax.xlane.f32.xlu0 %v4013_v53  ;;  %1963 = vmax.xlane.f32.xlu1 %v4007_v62 }
 0x5a5   : > { %1965 = vmax.xlane.f32.xlu0 %v4021_v8  ;;  %1959 = vmax.xlane.f32.xlu1 %v4018_v23 }
 0x5a9   : > { %1961 = vmax.xlane.f32.xlu0 %v4026_v11 }
 0x5f2   : > { %v1586_v37 = vpop.xlane.xlu0 %1585 }
 0x5f3   : > { %v1603_v2 = vsub.f32 %v3874_v35, %v1586_v37 }
 0x5f5   : > { %v1633_v39 = vmul.f32 1.442695, %v1603_v2 }
 0x5f6   : > { %v1582_v13 = vpop.xlane.xlu0 %1581  ;;  %v1588_v25 = vpop.xlane.xlu1 %1587 }
 0x5f7   : > { %v1604_v9 = vsub.f32 %v3885_v7, %v1588_v25  ;;  %v1601_v7 = vsub.f32 %v3880_v45, %v1582_v13 }
 0x5f9   : > { %v1635_v50 = vmul.f32 1.442695, %v1604_v9  ;;  %v1629_v35 = vmul.f32 1.442695, %v1601_v7 }
 0x5fa   : > { %v1990_v21 = vpop.xlane.xlu0 %1989  ;;  %v1988_v24 = vpop.xlane.xlu1 %1987 }
 0x5fb   : > { %v2006_v60 = vsub.f32 %v3889_v5, %v1990_v21  ;;  %v2005_v54 = vsub.f32 %v3887_v14, %v1988_v24  ;;  %3047 = vpow2.f32 %v1635_v50 }
 0x5fd   : > { %v2037_v40 = vmul.f32 1.442695, %v2006_v60  ;;  %v2035_v33 = vmul.f32 1.442695, %v2005_v54 }
 0x5fe   : > { %v1584_v43 = vpop.xlane.xlu0 %1583  ;;  %v1578_v36 = vpop.xlane.xlu1 %1577 }
 0x5ff   : > { %3049 = vpow2.f32 %v2037_v40  ;;  %v1602_v28 = vsub.f32 %v3903_v27, %v1584_v43  ;;  %v1599_v5 = vsub.f32 %v3898_v12, %v1578_v36 }
 0x600   : > { %3051 = vpow2.f32 %v2035_v33 }
 0x601   : > { %v1631_v10 = vmul.f32 1.442695, %v1602_v28  ;;  %v1625_v59 = vmul.f32 1.442695, %v1599_v5 }
 0x602   : > { %v1580_v17 = vpop.xlane.xlu0 %1579  ;;  %v1984_v46 = vpop.xlane.xlu1 %1983 }
 0x603   : > { %3053 = vpow2.f32 %v1631_v10  ;;  %v1600_v14 = vsub.f32 %v3910_v16, %v1580_v17  ;;  %v2003_v45 = vsub.f32 %v3912_v58, %v1984_v46 }
 0x604   : > { %3055 = vpow2.f32 %v1633_v39 }
 0x605   : > { %v1627_v29 = vmul.f32 1.442695, %v1600_v14  ;;  %v2031_v25 = vmul.f32 1.442695, %v2003_v45 }
 0x606   : > { %v1986_v19 = vpop.xlane.xlu0 %1985  ;;  %v1574_v44 = vpop.xlane.xlu1 %1573 }
 0x607   : > { %3057 = vpow2.f32 %v1627_v29  ;;  %v2004_v27 = vsub.f32 %v3921_v63, %v1986_v19  ;;  %v1597_v63 = vsub.f32 %v3919_v20, %v1574_v44 }
 0x608   : > { %3059 = vpow2.f32 %v1629_v35  ;;  %v4039_v38 = vpop.eup %3047 }
 0x609   : > { %v2033_v34 = vmul.f32 1.442695, %v2004_v27  ;;  %1667 = vadd.xlane.f32.xlu0 %v4039_v38 }
 0x60a   : > { %v1576_v16 = vpop.xlane.xlu0 %1575  ;;  %v1980_v37 = vpop.xlane.xlu1 %1979 }
 0x60b   : > { %3061 = vpow2.f32 %v2033_v34  ;;  %v1598_v12 = vsub.f32 %v3930_v6, %v1576_v16  ;;  %v1621_v6 = vmul.f32 1.442695, %v1597_v63  ;;  %v2001_v54 = vsub.f32 %v3925_v26, %v1980_v37 }
 0x60c   : > { %v4043_v13 = vpop.eup %3049  ;;  %3063 = vpow2.f32 %v1625_v59 }
 0x60d   : > { %v4046_v9 = vpop.eup %3051  ;;  %v1623_v50 = vmul.f32 1.442695, %v1598_v12  ;;  %2069 = vadd.xlane.f32.xlu0 %v4043_v13 }
 0x60e   : > { %2067 = vadd.xlane.f32.xlu1 %v4046_v9  ;;  %v1982_v58 = vpop.xlane.xlu0 %1981  ;;  %v1570_v21 = vpop.xlane.xlu1 %1569 }
 0x60f   : > { %3065 = vpow2.f32 %v1623_v50  ;;  %v2002_v24 = vsub.f32 %v3939_v61, %v1982_v58  ;;  %v2027_v61 = vmul.f32 1.442695, %v2001_v54  ;;  %v1595_v28 = vsub.f32 %v3937_v18, %v1570_v21 }
 0x610   : > { %v4051_v60 = vpop.eup %3053  ;;  %3067 = vpow2.f32 %v2031_v25 }
 0x611   : > { %v4054_v2 = vpop.eup %3055  ;;  %v2029_v20 = vmul.f32 1.442695, %v2002_v24  ;;  %1663 = vadd.xlane.f32.xlu0 %v4051_v60 }
 0x612   : > { %1665 = vadd.xlane.f32.xlu1 %v4054_v2  ;;  %v1572_v40 = vpop.xlane.xlu0 %1571  ;;  %v1976_v33 = vpop.xlane.xlu1 %1975 }
 0x613   : > { %3069 = vpow2.f32 %v2029_v20  ;;  %v1596_v43 = vsub.f32 %v3946_v22, %v1572_v40  ;;  %v1617_v22 = vmul.f32 1.442695, %v1595_v28  ;;  %v1999_v14 = vsub.f32 %v3948_v32, %v1976_v33 }
 0x614   : > { %v4059_v36 = vpop.eup %3057  ;;  %3071 = vpow2.f32 %v1621_v6 }
 0x615   : > { %v4062_v39 = vpop.eup %3059  ;;  %v1619_v26 = vmul.f32 1.442695, %v1596_v43  ;;  %1659 = vadd.xlane.f32.xlu0 %v4059_v36 }
 0x616   : > { %1661 = vadd.xlane.f32.xlu1 %v4062_v39  ;;  %v1978_v7 = vpop.xlane.xlu0 %1977  ;;  %v1566_v10 = vpop.xlane.xlu1 %1565 }
 0x617   : > { %3073 = vpow2.f32 %v1619_v26  ;;  %v2000_v17 = vsub.f32 %v3958_v41, %v1978_v7  ;;  %v2023_v41 = vmul.f32 1.442695, %v1999_v14  ;;  %v1593_v27 = vsub.f32 %v3956_v56, %v1566_v10 }
 0x618   : > { %v4067_v46 = vpop.eup %3061  ;;  %3075 = vpow2.f32 %v2027_v61 }
 0x619   : > { %v4070_v35 = vpop.eup %3063  ;;  %v2025_v18 = vmul.f32 1.442695, %v2000_v17  ;;  %2065 = vadd.xlane.f32.xlu0 %v4067_v46 }
 0x61a   : > { %1657 = vadd.xlane.f32.xlu1 %v4070_v35  ;;  %v1568_v5 = vpop.xlane.xlu0 %1567  ;;  %v1972_v29 = vpop.xlane.xlu1 %1971 }
 0x61b   : > { %3077 = vpow2.f32 %v2025_v18  ;;  %v1594_v19 = vsub.f32 %v3969_v51, %v1568_v5  ;;  %v1613_v51 = vmul.f32 1.442695, %v1593_v27  ;;  %v1997_v12 = vsub.f32 %v3963_v0, %v1972_v29 }
 0x61c   : > { %v4075_v44 = vpop.eup %3065  ;;  %3079 = vpow2.f32 %v1617_v22 }
 0x61d   : > { %v4078_v59 = vpop.eup %3067  ;;  %v1615_v32 = vmul.f32 1.442695, %v1594_v19  ;;  %1655 = vadd.xlane.f32.xlu0 %v4075_v44 }
 0x61e   : > { %2063 = vadd.xlane.f32.xlu1 %v4078_v59  ;;  %v1974_v45 = vpop.xlane.xlu0 %1973  ;;  %v1562_v34 = vpop.xlane.xlu1 %1561 }
 0x61f   : > { %3081 = vpow2.f32 %v1615_v32  ;;  %v1998_v16 = vsub.f32 %v3980_v1, %v1974_v45  ;;  %v2019_v1 = vmul.f32 1.442695, %v1997_v12  ;;  %v1591_v24 = vsub.f32 %v3977_v42, %v1562_v34 }
 0x620   : > { %v4083_v37 = vpop.eup %3069  ;;  %3083 = vpow2.f32 %v2023_v41 }
 0x621   : > { %v4086_v25 = vpop.eup %3071  ;;  %v2021_v56 = vmul.f32 1.442695, %v1998_v16  ;;  %2061 = vadd.xlane.f32.xlu0 %v4083_v37 }
 0x622   : > { %1653 = vadd.xlane.f32.xlu1 %v4086_v25  ;;  %v1564_v63 = vpop.xlane.xlu0 %1563  ;;  %v1968_v50 = vpop.xlane.xlu1 %1967 }
 0x623   : > { %3085 = vpow2.f32 %v2021_v56  ;;  %v1592_v58 = vsub.f32 %v3988_v31, %v1564_v63  ;;  %v1609_v31 = vmul.f32 1.442695, %v1591_v24  ;;  %v1995_v43 = vsub.f32 %v3991_v47, %v1968_v50 }
 0x624   : > { %v4091_v21 = vpop.eup %3073  ;;  %3087 = vpow2.f32 %v1613_v51 }
 0x625   : > { %v4094_v6 = vpop.eup %3075  ;;  %v1611_v0 = vmul.f32 1.442695, %v1592_v58  ;;  %1651 = vadd.xlane.f32.xlu0 %v4091_v21 }
 0x626   : > { %2059 = vadd.xlane.f32.xlu1 %v4094_v6  ;;  %v1970_v54 = vpop.xlane.xlu0 %1969  ;;  %v1558_v20 = vpop.xlane.xlu1 %1557 }
 0x627   : > { %3089 = vpow2.f32 %v1611_v0  ;;  %v1996_v40 = vsub.f32 %v4002_v48, %v1970_v54  ;;  %v2015_v48 = vmul.f32 1.442695, %v1995_v43  ;;  %v1589_v17 = vsub.f32 %v3999_v15, %v1558_v20  ;;  %v386_v0 = vld [vmem:[%s4291_s2 + $0x50] sm:$0xff]  ;;  %v387_v54 = vld [vmem:[%s4291_s2 + $0x58] sm:$0xff]  ;;  %v3193_v20 = vld [vmem:[%s4292_s3] sm:$0xff]  }
 0x628   : > { %v4099_v33 = vpop.eup %3077  ;;  %3091 = vpow2.f32 %v2019_v1  ;;  %v2220_v43 = vld [vmem:[%s4293_s4 + $0x10] sm:$0xff] }
 0x629   : > { %v4102_v61 = vpop.eup %3079  ;;  %v2017_v42 = vmul.f32 1.442695, %v1996_v40  ;;  %2057 = vadd.xlane.f32.xlu0 %v4099_v33  ;;  %v2218_v40 = vld [vmem:[%s4293_s4] sm:$0xff] }
 0x62a   : > { %1649 = vadd.xlane.f32.xlu1 %v4102_v61  ;;  %v1560_v28 = vpop.xlane.xlu0 %1559  ;;  %v1964_v7 = vpop.xlane.xlu1 %1963 }
 0x62b   : > { %3093 = vpow2.f32 %v2017_v42  ;;  %v1590_v26 = vsub.f32 %v4013_v53, %v1560_v28  ;;  %v1605_v53 = vmul.f32 1.442695, %v1589_v17  ;;  %v1993_v29 = vsub.f32 %v4007_v62, %v1964_v7  ;;  %v2219_v42 = vld [vmem:[%s4293_s4 + $0x8] sm:$0xff]  ;;  %v2285_v28 = vld [vmem:[%s4294_s5] sm:$0xff]  ;;  %v2287_v7 = vld [vmem:[%s4294_s5 + $0x10] sm:$0xff] }
 0x62c   : > { %v4107_v10 = vpop.eup %3081  ;;  %3095 = vpow2.f32 %v1609_v31  ;;  %v3194_v31 = vld [vmem:[%s4292_s3 + $0x8] sm:$0xff]   ;;  %v2313_v17 = vld [vmem:[%s4295_s6] sm:$0xff] }
 0x62d   : > { %v4110_v22 = vpop.eup %3083  ;;  %v1607_v47 = vmul.f32 1.442695, %v1590_v26  ;;  %1647 = vadd.xlane.f32.xlu0 %v4107_v10  ;;  %v2221_v26 = vld [vmem:[%s4293_s4 + $0x18] sm:$0xff] }
 0x62e   : > { %2055 = vadd.xlane.f32.xlu1 %v4110_v22  ;;  %v1966_v14 = vpop.xlane.xlu0 %1965  ;;  %v1960_v41 = vpop.xlane.xlu1 %1959 }
 0x62f   : > { %3097 = vpow2.f32 %v1607_v47  ;;  %v1994_v18 = vsub.f32 %v4021_v8, %v1966_v14  ;;  %v2011_v8 = vmul.f32 1.442695, %v1993_v29  ;;  %v1991_v34 = vsub.f32 %v4018_v23, %v1960_v41  ;;  %v2288_v47 = vld [vmem:[%s4294_s5 + $0x18] sm:$0xff]  ;;  %v2315_v14 = vld [vmem:[%s4295_s6 + $0x10] sm:$0xff] }
 0x630   : > { %v4115_v5 = vpop.eup %3085  ;;  %3099 = vpow2.f32 %v2015_v48  ;;  %v2286_v48 = vld [vmem:[%s4294_s5 + $0x8] sm:$0xff] }
 0x631   : > { %v4118_v19 = vpop.eup %3087  ;;  %v2013_v15 = vmul.f32 1.442695, %v1994_v18  ;;  %2053 = vadd.xlane.f32.xlu0 %v4115_v5  ;;  %v2007_v12 = vmul.f32 1.442695, %v1991_v34  ;;  %v2314_v18 = vld [vmem:[%s4295_s6 + $0x8] sm:$0xff] }
 0x632   : > { %1645 = vadd.xlane.f32.xlu1 %v4118_v19  ;;  %v1962_v27 = vpop.xlane.xlu0 %1961 }
 0x633   : > { %3101 = vpow2.f32 %v2013_v15  ;;  %v1992_v32 = vsub.f32 %v4026_v11, %v1962_v27 }
 0x634   : > { %v4123_v45 = vpop.eup %3089  ;;  %3103 = vpow2.f32 %v1605_v53  ;;  %v2316_v53 = vld [vmem:[%s4295_s6 + $0x18] sm:$0xff] }
 0x635   : > { %v4126_v16 = vpop.eup %3091  ;;  %v2009_v62 = vmul.f32 1.442695, %v1992_v32  ;;  %1643 = vadd.xlane.f32.xlu0 %v4123_v45 }
 0x636   : > { %2051 = vadd.xlane.f32.xlu1 %v4126_v16 }
 0x637   : > { %3105 = vpow2.f32 %v2009_v62 }
 0x638   : > { %v4130_v51 = vpop.eup %3093  ;;  %3107 = vpow2.f32 %v2011_v8 }
 0x639   : > { %v4132_v56 = vpop.eup %3095  ;;  %2049 = vadd.xlane.f32.xlu0 %v4130_v51  ;;  %3109 = vpow2.f32 %v2007_v12 }
 0x63a   : > { %1641 = vadd.xlane.f32.xlu1 %v4132_v56 }
 0x63c   : > { %v4136_v11 = vpop.eup %3097 }
 0x63d   : > { %v4138_v23 = vpop.eup %3099  ;;  %1639 = vadd.xlane.f32.xlu0 %v4136_v11 }
 0x63e   : > { %2047 = vadd.xlane.f32.xlu1 %v4138_v23 }
 0x640   : > { %v4142_v63 = vpop.eup %3101 }
 0x641   : > { %v4144_v50 = vpop.eup %3103  ;;  %2045 = vadd.xlane.f32.xlu0 %v4142_v63 }
 0x642   : > { %1637 = vadd.xlane.f32.xlu1 %v4144_v50 }
 0x644   : > { %v4148_v58 = vpop.eup %3105 }
 0x645   : > { %v4150_v1 = vpop.eup %3107  ;;  %2041 = vadd.xlane.f32.xlu0 %v4148_v58 }
 0x646   : > { %2043 = vadd.xlane.f32.xlu1 %v4150_v1  ;;  %v4154_v24 = vpop.eup %3109 }
 0x64a   : > { %2039 = vadd.xlane.f32.xlu1 %v4154_v24 }
 0x65b   : > { %440 = vperm.xlu1 %2906, %v386_v0   ;;  %445 = vperm.xlu0 %2905, %v387_v54  }
 0x65f   : > { %1750 = vrot.lane.b32.xlu1 %v3193_v20, %s3225_s17  ;;  %2152 = vrot.lane.b32.xlu0 %v3193_v20, %s3226_s18 }
 0x663   : > { %1752 = vrot.lane.b32.xlu1 %v3194_v31, %s3225_s17  ;;  %2224 = vperm.xlu0 %2905, %v2218_v40   ;;  %s2569_s17 = sshll.u32 (%p3302_p5), %s2495_s30, 2 }
 0x664   : > { %s2385_s20 = scalar_lea.vmem (%p3302_p5), %s4297_s8, %s2569_s17 }
 0x667   : > { %2154 = vrot.lane.b32.xlu1 %v3194_v31, %s3226_s18  ;;  %2234 = vperm.xlu0 %2905, %v2220_v43  }
 0x66b   : > { %2229 = vperm.xlu1 %2906, %v2219_v42   ;;  %2291 = vperm.xlu0 %2905, %v2285_v28  }
 0x66f   : > { %2239 = vperm.xlu1 %2906, %v2221_v26   ;;  %2301 = vperm.xlu0 %2905, %v2287_v7  }
 0x673   : > { %2296 = vperm.xlu1 %2906, %v2286_v48   ;;  %2319 = vperm.xlu0 %2905, %v2313_v17  }
 0x677   : > { %2306 = vperm.xlu1 %2906, %v2288_v47   ;;  %2329 = vperm.xlu0 %2905, %v2315_v14  }
 0x67b   : > { %2324 = vperm.xlu1 %2906, %v2314_v18  }
 0x67f   : > { %2334 = vperm.xlu1 %2906, %v2316_v53  }
 0x692   : > { %v1668_v29 = vpop.xlane.xlu0 %1667 }
 0x696   : > { %v2070_v15 = vpop.xlane.xlu0 %2069 }
 0x697   : > { %v2068_v41 = vpop.xlane.xlu1 %2067  ;;  %3111 = vrcp.f32 %v2070_v15 }
 0x698   : > { %3113 = vrcp.f32 %v2068_v41 }
 0x699   : > { %3115 = vrcp.f32 %v1668_v29 }
 0x69a   : > { %v1664_v27 = vpop.xlane.xlu0 %1663 }
 0x69b   : > { %v1666_v32 = vpop.xlane.xlu1 %1665 }
 0x69c   : > { %3117 = vrcp.f32 %v1666_v32 }
 0x69e   : > { %v1660_v8 = vpop.xlane.xlu0 %1659 }
 0x69f   : > { %v1662_v34 = vpop.xlane.xlu1 %1661 }
 0x6a0   : > { %3119 = vrcp.f32 %v1662_v34 }
 0x6a1   : > { %3121 = vrcp.f32 %v1664_v27 }
 0x6a2   : > { %v2066_v62 = vpop.xlane.xlu0 %2065 }
 0x6a3   : > { %v1658_v12 = vpop.xlane.xlu1 %1657  ;;  %3123 = vrcp.f32 %v2066_v62 }
 0x6a4   : > { %v3112_v0 = vpop.eup %3111  ;;  %3125 = vrcp.f32 %v1658_v12 }
 0x6a5   : > { %v3114_v54 = vpop.eup %3113  ;;  %v2102_v20 = vmul.f32 %v3112_v0, %v4043_v13 }
 0x6a6   : > { %v1656_v40 = vpop.xlane.xlu0 %1655  ;;  %v2101_v43 = vmul.f32 %v3114_v54, %v4046_v9  ;;  %v3116_v42 = vpop.eup %3115 }
 0x6a7   : > { %v2064_v31 = vpop.xlane.xlu1 %2063  ;;  %v1700_v47 = vmul.f32 %v3116_v42, %v4039_v38 }
 0x6a8   : > { %3127 = vrcp.f32 %v2064_v31  ;;  %v2110_v28 = vpack.c.bf16 %v2102_v20, %v2101_v43 }
 0x6a9   : > { %v3118_v26 = vpop.eup %3117  ;;  %3129 = vrcp.f32 %v1660_v8 }
 0x6aa   : > { %2842 = vmatpush3.bf16.xpose.msra.mxu0 %v2110_v28  ;;  %v2062_v7 = vpop.xlane.xlu0 %2061  ;;  %v1699_v17 = vmul.f32 %v3118_v26, %v4054_v2 }
 0x6ab   : > { %v1654_v48 = vpop.xlane.xlu1 %1653  ;;  %2843 = vmatprep.subr.bf16.mxu0 %v3222_v52  ;;  %3131 = vrcp.f32 %v2062_v7 }
 0x6ac   : > { %v1708_v13 = vpack.c.bf16 %v1700_v47, %v1699_v17  ;;  %3133 = vrcp.f32 %v1654_v48 }
 0x6ad   : > { %v3120_v14 = vpop.eup %3119 }
 0x6ae   : > { %2798 = vmatpush3.bf16.xpose.msra.mxu1 %v1708_v13  ;;  %v1652_v9 = vpop.xlane.xlu0 %1651  ;;  %v3122_v53 = vpop.eup %3121  ;;  %v1697_v29 = vmul.f32 %v3120_v14, %v4062_v39 }
 0x6af   : > { %v2060_v18 = vpop.xlane.xlu1 %2059  ;;  %2799 = vmatprep.subr.bf16.mxu1 %v3222_v52  ;;  %v1698_v38 = vmul.f32 %v3122_v53, %v4051_v60 }
 0x6b0   : > { %3135 = vrcp.f32 %v2060_v18  ;;  %v3124_v41 = vpop.eup %3123 }
 0x6b1   : > { %3137 = vrcp.f32 %v1656_v40  ;;  %v3126_v27 = vpop.eup %3125  ;;  %v1707_v32 = vpack.c.bf16 %v1698_v38, %v1697_v29  ;;  %v2100_v0 = vmul.f32 %v3124_v41, %v4067_v46 }
 0x6b2   : > { %v2058_v15 = vpop.xlane.xlu0 %2057  ;;  %v1695_v60 = vmul.f32 %v3126_v27, %v4070_v35 }
 0x6b3   : > { %v1650_v2 = vpop.xlane.xlu1 %1649  ;;  %3139 = vrcp.f32 %v2058_v15 }
 0x6b4   : > { %3141 = vrcp.f32 %v1650_v2 }
 0x6b5   : > { %v3128_v8 = vpop.eup %3127 }
 0x6b6   : > { %2800 = vmatpush3.bf16.xpose.msra.mxu1 %v1707_v32  ;;  %v1648_v34 = vpop.xlane.xlu0 %1647  ;;  %v2099_v12 = vmul.f32 %v3128_v8, %v4078_v59  ;;  %v3130_v54 = vpop.eup %3129 }
 0x6b7   : > { %v2056_v62 = vpop.xlane.xlu1 %2055  ;;  %2801 = vmatprep.subr.bf16.mxu1 %v3222_v52  ;;  %v1696_v31 = vmul.f32 %v3130_v54, %v4059_v36 }
 0x6b8   : > { %3143 = vrcp.f32 %v2056_v62  ;;  %v2109_v39 = vpack.c.bf16 %v2100_v0, %v2099_v12  ;;  %v3132_v43 = vpop.eup %3131 }
 0x6b9   : > { %3145 = vrcp.f32 %v1652_v9  ;;  %v3134_v59 = vpop.eup %3133  ;;  %v1706_v42 = vpack.c.bf16 %v1696_v31, %v1695_v60  ;;  %v2098_v35 = vmul.f32 %v3132_v43, %v4083_v37 }
 0x6ba   : > { %2844 = vmatpush3.bf16.xpose.msra.mxu0 %v2109_v39  ;;  %v2054_v20 = vpop.xlane.xlu0 %2053  ;;  %v1693_v17 = vmul.f32 %v3134_v59, %v4086_v25 }
 0x6bb   : > { %v1646_v40 = vpop.xlane.xlu1 %1645  ;;  %2845 = vmatprep.subr.bf16.mxu0 %v3222_v52  ;;  %3147 = vrcp.f32 %v2054_v20 }
 0x6bc   : > { %3149 = vrcp.f32 %v1646_v40 }
 0x6bd   : > { %v3136_v46 = vpop.eup %3135 }
 0x6be   : > { %2802 = vmatpush3.bf16.xpose.msra.mxu1 %v1706_v42  ;;  %v1644_v28 = vpop.xlane.xlu0 %1643  ;;  %v2097_v7 = vmul.f32 %v3136_v46, %v4094_v6  ;;  %v3138_v48 = vpop.eup %3137 }
 0x6bf   : > { %v2052_v26 = vpop.xlane.xlu1 %2051  ;;  %2803 = vmatprep.subr.bf16.mxu1 %v3222_v52  ;;  %v1694_v14 = vmul.f32 %v3138_v48, %v4075_v44 }
 0x6c0   : > { %3151 = vrcp.f32 %v2052_v26  ;;  %v2108_v36 = vpack.c.bf16 %v2098_v35, %v2097_v7  ;;  %v3140_v9 = vpop.eup %3139 }
 0x6c1   : > { %3153 = vrcp.f32 %v1648_v34  ;;  %v3142_v6 = vpop.eup %3141  ;;  %v1705_v18 = vpack.c.bf16 %v1694_v14, %v1693_v17  ;;  %v2096_v25 = vmul.f32 %v3140_v9, %v4099_v33 }
 0x6c2   : > { %2846 = vmatpush3.bf16.xpose.msra.mxu0 %v2108_v36  ;;  %v2050_v47 = vpop.xlane.xlu0 %2049  ;;  %v1691_v38 = vmul.f32 %v3142_v6, %v4102_v61 }
 0x6c3   : > { %v1642_v13 = vpop.xlane.xlu1 %1641  ;;  %2847 = vmatprep.subr.bf16.mxu0 %v3222_v52  ;;  %3155 = vrcp.f32 %v2050_v47 }
 0x6c4   : > { %3157 = vrcp.f32 %v1642_v13 }
 0x6c5   : > { %v3144_v37 = vpop.eup %3143 }
 0x6c6   : > { %2804 = vmatpush3.bf16.xpose.msra.mxu1 %v1705_v18  ;;  %v1640_v53 = vpop.xlane.xlu0 %1639  ;;  %v2095_v15 = vmul.f32 %v3144_v37, %v4110_v22  ;;  %v3146_v2 = vpop.eup %3145 }
 0x6c7   : > { %v2048_v29 = vpop.xlane.xlu1 %2047  ;;  %2805 = vmatprep.subr.bf16.mxu1 %v3222_v52  ;;  %v1692_v27 = vmul.f32 %v3146_v2, %v4091_v21 }
 0x6c8   : > { %3159 = vrcp.f32 %v2048_v29  ;;  %v2107_v44 = vpack.c.bf16 %v2096_v25, %v2095_v15  ;;  %v3148_v32 = vpop.eup %3147 }
 0x6c9   : > { %3161 = vrcp.f32 %v1644_v28  ;;  %v3150_v22 = vpop.eup %3149  ;;  %v1704_v34 = vpack.c.bf16 %v1692_v27, %v1691_v38  ;;  %v2094_v0 = vmul.f32 %v3148_v32, %v4115_v5 }
 0x6ca   : > { %2848 = vmatpush3.bf16.xpose.msra.mxu0 %v2107_v44  ;;  %v2046_v8 = vpop.xlane.xlu0 %2045  ;;  %v1689_v54 = vmul.f32 %v3150_v22, %v4118_v19 }
 0x6cb   : > { %v1638_v41 = vpop.xlane.xlu1 %1637  ;;  %2849 = vmatprep.subr.bf16.mxu0 %v3222_v52  ;;  %3163 = vrcp.f32 %v2046_v8 }
 0x6cc   : > { %3165 = vrcp.f32 %v1638_v41 }
 0x6cd   : > { %v3152_v33 = vpop.eup %3151 }
 0x6ce   : > { %2806 = vmatpush3.bf16.xpose.msra.mxu1 %v1704_v34  ;;  %v2093_v12 = vmul.f32 %v3152_v33, %v4126_v16  ;;  %v3154_v61 = vpop.eup %3153  ;;  %v2042_v40 = vpop.xlane.xlu0 %2041 }
 0x6cf   : > { %v2044_v62 = vpop.xlane.xlu1 %2043  ;;  %2807 = vmatprep.subr.bf16.mxu1 %v3222_v52  ;;  %v1690_v60 = vmul.f32 %v3154_v61, %v4107_v10 }
 0x6d0   : > { %3167 = vrcp.f32 %v2044_v62  ;;  %v2106_v21 = vpack.c.bf16 %v2094_v0, %v2093_v12  ;;  %v3156_v20 = vpop.eup %3155 }
 0x6d1   : > { %3169 = vrcp.f32 %v1640_v53  ;;  %v3158_v16 = vpop.eup %3157  ;;  %v1703_v5 = vpack.c.bf16 %v1690_v60, %v1689_v54  ;;  %v2092_v59 = vmul.f32 %v3156_v20, %v4130_v51 }
 0x6d2   : > { %2850 = vmatpush3.bf16.xpose.msra.mxu0 %v2106_v21  ;;  %v1687_v10 = vmul.f32 %v3158_v16, %v4132_v56 }
 0x6d3   : > { %v2040_v39 = vpop.xlane.xlu1 %2039  ;;  %2851 = vmatprep.subr.bf16.mxu0 %v3222_v52 }
 0x6d4   : > { %3171 = vrcp.f32 %v2040_v39  ;;  %v3195_v39 = vld [vmem:[%s3325_s10 + $0x8] sm:$0xff]  }
 0x6d5   : > { %v3160_v31 = vpop.eup %3159  ;;  %3173 = vrcp.f32 %v2042_v40  ;;  %v362_v60 = vunpack.c.l.bf16 %v3195_v39 }
 0x6d6   : > { %2808 = vmatpush3.bf16.xpose.msra.mxu1 %v1703_v5  ;;  %v2091_v43 = vmul.f32 %v3160_v31, %v4138_v23  ;;  %v3162_v19 = vpop.eup %3161  ;;  %v446_v6 = vpop.permute.xlu0 %445  ;;  %v3196_v31 = vld [vmem:[%s3325_s10] sm:$0xff]   ;;  %s354_s10 = scalar_lea.vmem [#allocation3], %s3318_s24 }
 0x6d7   : > { %2809 = vmatprep.subr.bf16.mxu1 %v3222_v52  ;;  %v1688_v46 = vmul.f32 %v3162_v19, %v4123_v45  ;;  %v441_v13 = vpop.permute.xlu1 %440 }
 0x6d8   : > { %v2105_v42 = vpack.c.bf16 %v2092_v59, %v2091_v43  ;;  %v3164_v28 = vpop.eup %3163  ;;  %v360_v43 = vunpack.c.l.bf16 %v3196_v31 }
 0x6d9   : > { %v3166_v26 = vpop.eup %3165  ;;  %v1702_v7 = vpack.c.bf16 %v1688_v46, %v1687_v10  ;;  %v2090_v51 = vmul.f32 %v3164_v28, %v4142_v63  ;;  %v363_v10 = vunpack.c.h.bf16 %v3195_v39 }
 0x6da   : > { %2852 = vmatpush3.bf16.xpose.msra.mxu0 %v2105_v42  ;;  %v1685_v56 = vmul.f32 %v3166_v26, %v4144_v50  ;;  %v587_v50 = vadd.f32 %v3390_v57, %v446_v6  ;;  %v2153_v41 = vpop.permute.xlu0 %2152 }
 0x6db   : > { %2853 = vmatprep.subr.bf16.mxu0 %v3222_v52  ;;  %v1751_v53 = vpop.permute.xlu1 %1750 }
 0x6dd   : > { %v3168_v35 = vpop.eup %3167 }
 0x6de   : > { %2810 = vmatpush3.bf16.xpose.msra.mxu1 %v1702_v7  ;;  %v2089_v23 = vmul.f32 %v3168_v35, %v4150_v1  ;;  %v3170_v48 = vpop.eup %3169  ;;  %v584_v1 = vadd.f32 %v3386_v55, %v441_v13  ;;  %v2225_v62 = vpop.permute.xlu0 %2224 }
 0x6df   : > { %2811 = vmatprep.subr.bf16.mxu1 %v3222_v52  ;;  %v1686_v45 = vmul.f32 %v3170_v48, %v4136_v11  ;;  %v1818_v11 = vpack.c.bf16 %v587_v50, %v587_v50  ;;  %v1753_v2 = vpop.permute.xlu1 %1752 }
 0x6e0   : > { %v2104_v36 = vpack.c.bf16 %v2090_v51, %v2089_v23  ;;  %v1416_v37 = vpack.c.bf16 %v584_v1, %v584_v1  ;;  %v361_v51 = vunpack.c.h.bf16 %v3196_v31 }
 0x6e1   : > { %v3172_v17 = vpop.eup %3171  ;;  %v1701_v14 = vpack.c.bf16 %v1686_v45, %v1685_v56 }
 0x6e2   : > { %2854 = vmatpush3.bf16.xpose.msra.mxu0 %v2104_v36  ;;  %v3174_v47 = vpop.eup %3173  ;;  %v2087_v9 = vmul.f32 %v3172_v17, %v4154_v24  ;;  %v2235_v16 = vpop.permute.xlu0 %2234 }
 0x6e3   : > { %2855 = vmatprep.subr.bf16.mxu0 %v3222_v52  ;;  %v2088_v63 = vmul.f32 %v3174_v47, %v4148_v58  ;;  %v2155_v22 = vpop.permute.xlu1 %2154 }
 0x6e5   : > { %v2103_v18 = vpack.c.bf16 %v2088_v63, %v2087_v9 }
 0x6e6   : > { %2812 = vmatpush3.bf16.xpose.msra.mxu1 %v1701_v14 }
 0x6e7   : > { %v2230_v21 = vpop.permute.xlu1 %2229 }
 0x6ea   : > { %2856 = vmatpush3.bf16.xpose.msra.mxu0 %v2103_v18 }
 0x6eb   : > { %v2240_v35 = vpop.permute.xlu1 %2239 }
 0x6ed   : > { %2814 = vmatmul.mubr.bf16.vlgmr.msra.gmra.mxu1 %v1416_v37 }
 0x6ee   : > { %2819 = vmatprep.mubr.msk.bf16.mxu1 %vm629_vm2, %v1751_v53 }
 0x6f1   : > { %2858 = vmatmul.mubr.bf16.vlgmr.msra.gmra.mxu0 %v1818_v11 }
 0x7ad   : > { %v1743_v29 = vpop.f32.mrf.mxu1 }
 0x7ae   : > { %v1749_v15 = vpack.c.bf16 %v1743_v29, %v1743_v29 }
 0x7af   : > { %v2815_v24 = vpop.f32.mrf.mxu1 }
 0x7b0   : > { %v1761_v25 = vsel %vm654_vm1, %v1749_v15, 0  ;;  %2872 = vmatprep.subr.msk.bf16.mxu1 %vm654_vm1, %v1749_v15 }
 0x7b1   : > { %v1746_v55 = vpop.f32.mrf.mxu1  ;;  %2818 = vmatpush3.bf16.msra.mxu1 %v1761_v25  ;;  %v2145_v58 = vpop.f32.mrf.mxu0 }
 0x7b2   : > { %v2151_v44 = vpack.c.bf16 %v2145_v58, %v2145_v58 }
 0x7b3   : > { %v2816_v57 = vpop.f32.mrf.mxu1  ;;  %v2859_v38 = vpop.f32.mrf.mxu0 }
 0x7b4   : > { %v2163_v27 = vsel %vm654_vm1, %v2151_v44, 0  ;;  %2820 = vmatmul.mubr.msk.bf16.vlgmr.msra.gmra.mxu1 %vm629_vm2, %v1753_v2  ;;  %2874 = vmatprep.subr.msk.bf16.mxu1 %vm654_vm1, %v2151_v44 }
 0x7b5   : > { %v2148_v32 = vpop.f32.mrf.mxu0  ;;  %2862 = vmatpush3.bf16.msra.mxu1 %v2163_v27  ;;  %2863 = vmatprep.mubr.msk.bf16.mxu1 %vm629_vm2, %v2153_v41 }
 0x7b7   : > { %v2860_v8 = vpop.f32.mrf.mxu0 }
 0x7bc   : > { %2864 = vmatmul.mubr.msk.bf16.vlgmr.msra.gmra.mxu1 %vm629_vm2, %v2155_v22 }
 0x874   : > { %v2821_v34 = vpop.f32.mrf.mxu1 }
 0x875   : > { %v1814_v61 = vadd.f32 %v2821_v34, %v3845_v3  ;;  %v2292_v34 = vpop.permute.xlu0 %2291 }
 0x876   : > { %v1797_v33 = vpop.f32.mrf.mxu1 }
 0x877   : > { %v1812_v20 = vadd.f32 %v1797_v33, %v3849_v4  ;;  %v2297_v33 = vpop.permute.xlu1 %2296 }
 0x878   : > { %v2822_v12 = vpop.f32.mrf.mxu1 }
 0x879   : > { %v1815_v59 = vadd.f32 %v2822_v12, %v3851_v30 }
 0x87a   : > { %v1800_v0 = vpop.f32.mrf.mxu1 }
 0x87b   : > { %v1813_v28 = vadd.f32 %v1800_v0, %v3855_v49  ;;  %v2307_v12 = vpop.permute.xlu1 %2306 }
 0x87c   : > { %v2865_v54 = vpop.f32.mrf.mxu1 }
 0x87d   : > { %v2216_v40 = vadd.f32 %v2865_v54, %v1814_v61 }
 0x87e   : > { %v2199_v5 = vpop.f32.mrf.mxu1 }
 0x87f   : > { %v2244_v19 = vadd.f32 %v2235_v16, %v2216_v40  ;;  %v2214_v42 = vadd.f32 %v2199_v5, %v1812_v20  ;;  %v2325_v61 = vpop.permute.xlu1 %2324 }
 0x880   : > { %v2866_v46 = vpop.f32.mrf.mxu1 }
 0x881   : > { %v2248_v3 = vadd.f32 %v2244_v19, %v362_v60  ;;  %v2242_v26 = vadd.f32 %v2225_v62, %v2214_v42  ;;  %v2217_v7 = vadd.f32 %v2866_v46, %v1815_v59  ;;  %v2302_v62 = vpop.permute.xlu0 %2301 }
 0x882   : > { %v2202_v23 = vpop.f32.mrf.mxu1 }
 0x883   : > { %v2246_v4 = vadd.f32 %v2242_v26, %v360_v43  ;;  %v2245_v48 = vadd.f32 %v2240_v35, %v2217_v7  ;;  %v2215_v36 = vadd.f32 %v2202_v23, %v1813_v28  ;;  %v2335_v59 = vpop.permute.xlu1 %2334 }
 0x885   : > { %v2249_v56 = vadd.f32 %v2245_v48, %v363_v10  ;;  %v2243_v17 = vadd.f32 %v2230_v21, %v2215_v36  ;;  %v2320_v0 = vpop.permute.xlu0 %2319 }
 0x887   : > { %v2247_v45 = vadd.f32 %v2243_v17, %v361_v51 }
 0x889   : > { %v2250_v47 = vadd.f32 %v2247_v45, %v2246_v4  ;;  %v2330_v43 = vpop.permute.xlu0 %2329 }
 0x88b   : > { %v2251_v30 = vadd.f32 %v2250_v47, %v2248_v3 }
 0x88d   : > { %v2252_v13 = vadd.f32 %v2251_v30, %v2249_v56 }
 0x88f   : > { %v2253_v14 = vrot.slane %v2252_v13, 4 }
 0x891   : > { %v2254_v9 = vadd.f32 %v2253_v14, %v2252_v13 }
 0x893   : > { %v2255_v63 = vrot.slane %v2254_v9, 2 }
 0x895   : > { %v2256_v1 = vadd.f32 %v2255_v63, %v2254_v9 }
 0x897   : > { %v2257_v49 = vrot.slane %v2256_v1, 1 }
 0x899   : > { %v2258_v6 = vadd.f32 %v2257_v49, %v2256_v1 }
 0x89b   : > { %v2260_v18 = vmul.f32 0.03125, %v2258_v6 }
 0x89d   : > { %v2261_v50 = vsub.f32 %v2246_v4, %v2260_v18  ;;  %v2262_v37 = vsub.f32 %v2247_v45, %v2260_v18  ;;  %v2263_v53 = vsub.f32 %v2248_v3, %v2260_v18  ;;  %v2264_v11 = vsub.f32 %v2249_v56, %v2260_v18 }
 0x89f   : > { %v2265_v29 = vmul.f32 %v2261_v50, %v2261_v50  ;;  %v2266_v15 = vmul.f32 %v2262_v37, %v2262_v37  ;;  %v2267_v24 = vmul.f32 %v2263_v53, %v2263_v53  ;;  %v2268_v55 = vmul.f32 %v2264_v11, %v2264_v11 }
 0x8a1   : > { %v2269_v25 = vadd.f32 %v2266_v15, %v2265_v29 }
 0x8a3   : > { %v2270_v58 = vadd.f32 %v2269_v25, %v2267_v24 }
 0x8a5   : > { %v2271_v2 = vadd.f32 %v2270_v58, %v2268_v55 }
 0x8a7   : > { %v2272_v44 = vrot.slane %v2271_v2, 4 }
 0x8a9   : > { %v2273_v57 = vadd.f32 %v2272_v44, %v2271_v2 }
 0x8ab   : > { %v2274_v38 = vrot.slane %v2273_v57, 2 }
 0x8ad   : > { %v2275_v41 = vadd.f32 %v2274_v38, %v2273_v57 }
 0x8af   : > { %v2276_v27 = vrot.slane %v2275_v41, 1 }
 0x8b1   : > { %v2277_v32 = vadd.f32 %v2276_v27, %v2275_v41 }
 0x8b3   : > { %v2278_v8 = vmul.f32 0.03125, %v2277_v32 }
 0x8b5   : > { %v2279_v22 = vadd.f32 1e-05, %v2278_v8 }
 0x8b7   : > { %3175 = vrsqrt.f32 %v2279_v22 }
 0x8c4   : > { %v3176_v21 = vpop.eup %3175 }
 0x8c5   : > { %v2281_v54 = vmul.f32 %v3176_v21, %v2261_v50  ;;  %v2282_v39 = vmul.f32 %v3176_v21, %v2262_v37  ;;  %v2283_v60 = vmul.f32 %v3176_v21, %v2263_v53  ;;  %v2284_v20 = vmul.f32 %v3176_v21, %v2264_v11 }
 0x8c7   : > { %v2309_v40 = vmul.f32 %v2292_v34, %v2281_v54  ;;  %v2310_v16 = vmul.f32 %v2297_v33, %v2282_v39  ;;  %v2311_v5 = vmul.f32 %v2302_v62, %v2283_v60  ;;  %v2312_v31 = vmul.f32 %v2307_v12, %v2284_v20 }
 0x8c9   : > { %v2337_v19 = vadd.f32 %v2320_v0, %v2309_v40  ;;  %v2338_v42 = vadd.f32 %v2325_v61, %v2310_v16  ;;  %v2339_v10 = vadd.f32 %v2330_v43, %v2311_v5  ;;  %v2340_v46 = vadd.f32 %v2335_v59, %v2312_v31 }
 0x8cb   : > { %v2341_v28 = vmul.f32 0.5, %v2337_v19  ;;  %v2342_v3 = vmul.f32 0.5, %v2338_v42  ;;  %v2343_v26 = vmul.f32 0.5, %v2339_v10  ;;  %v2344_v7 = vmul.f32 0.5, %v2340_v46 }
 0x8cd   : > { %vm2345_vm4 = vcmp.ge.f32.partialorder %v2341_v28, 1.0  ;;  %vm2346_vm5 = vcmp.ge.f32.partialorder %v2342_v3, 1.0  ;;  %vm2347_vm6 = vcmp.ge.f32.partialorder %v2343_v26, 1.0  ;;  %vm2348_vm7 = vcmp.ge.f32.partialorder %v2344_v7, 1.0  ;;  %2383 = sbr.rel (!%p3302_p5) target bundleno = 2267 (0x8db), region = 97 }
 0x8ce   : > { %v2560_v35 = vsel %vm2345_vm4, 1.0, %v3222_v52  ;;  %v2561_v23 = vsel %vm2346_vm5, 1.0, %v3222_v52  ;;  %v2562_v51 = vsel %vm2347_vm6, 1.0, %v3222_v52  ;;  %v2563_v4 = vsel %vm2348_vm7, 1.0, %v3222_v52 }
 0x8cf   : > { %v2577_v48 = vpack.c.bf16 %v2561_v23, %v2560_v35  ;;  %v2580_v36 = vpack.c.bf16 %v2563_v4, %v2562_v51 }
 0x8d1   : > { %2578 = vst [vmem:[%s354_s10] sm:$0xff] %v2577_v48   ;;  %2582 = vst [vmem:[%s354_s10 + $0x8] sm:$0xff] %v2580_v36  }
 0x8d8   : > { %v2402_v56 = vld [vmem:[%s354_s10] sm:$0xf]  ;;  %v2404_v17 = vld [vmem:[%s354_s10 + $0x4] sm:$0xf]  ;;  %v2406_v45 = vld [vmem:[%s354_s10 + $0x8] sm:$0xf] }
 0x8d9   : > { %v2408_v47 = vld [vmem:[%s354_s10 + $0xc] sm:$0xf]  ;;  %2403 = vst [vmem:[%s2385_s20] sm:$0xf] %v2402_v56  ;;  %2405 = vst [vmem:[%s2385_s20 + $0x20] sm:$0xf] %v2404_v17 }
 0x8da   : > { %2407 = vst [vmem:[%s2385_s20 + $0x40] sm:$0xf] %v2406_v45  ;;  %2409 = vst [vmem:[%s2385_s20 + $0x60] sm:$0xf] %v2408_v47 }
 0x8db PF: > { %p15_p10 = scmp.ge.s32.totalorder %s3289_s9, 10   ;;  %s4299_s27 = smov %s3215_s28 }
 0x8dc   : > { %s4300_s28 = smov %s3300_s12  ;;  %s4301_s29 = smov %s3289_s9 }
 0x8dd   :  { %17 = sbr.rel (!%p15_p10) target bundleno = 2 (0x2), region = 169 }

</bundles_post_ra>
